<compile_context>
chip_gen: v6e
topology: v6e:2x2x1
jax: 0.10.0
libtpu: 0.0.40
codegen_flags: <defaults>
</compile_context>

<pallas_src>
import functools

import jax
import jax.numpy as jnp
from jax.experimental import pallas as pl
from jax.experimental.pallas import tpu as pltpu


def _round_up(x, m):
    return (x + m - 1) // m * m


def _pick_row_tile(H_out, W_out, stride, K, Wp, cin_pad, cout_pad,
                   in_itemsize, out_itemsize, *, cap=None,
                   budget_bytes=4 * 2**20):
    """Largest H_out divisor whose per-tile working set fits the VMEM budget."""
    def tile_bytes(th):
        th_in = (th - 1) * stride + K
        return (th_in * Wp * cin_pad * in_itemsize           # halo'd input rows
                + 2 * th * W_out * cout_pad * out_itemsize   # output double-buffer
                + 2 * th * W_out * cin_pad * 4)              # f32 acc + slack

    divisors = [d for d in range(1, H_out + 1) if H_out % d == 0]
    # keep the flattened (TH*W_out) store axis 8-aligned unless the tile spans
    # the whole output (full-extent blocks are always legal).
    legal = [d for d in divisors if d == H_out or (d * W_out) % 8 == 0]
    if cap is not None:
        capped = [d for d in legal if d <= cap]
        legal = capped or [min(legal)]
    fitting = [d for d in legal if tile_bytes(d) <= budget_bytes]
    return max(fitting) if fitting else min(legal)


def _dsconv_kernel(x_hbm, dw_w_ref, dw_b_ref, pw_w_ref, pw_b_ref, o_ref,
                   x_vmem, dma_sem, *, K, stride, TH, W_out, mxu_dtype):
    """One grid step = (batch b, output-row tile t).

    x_hbm    : (N, Hp, Wp, Cin_pad)    full padded input, left in HBM (pl.ANY)
    dw_w_ref : (KK_pad, Cin_pad)       depthwise weights, tap-major, zero-padded
    dw_b_ref : (1, Cin_pad)            depthwise bias
    pw_w_ref : (Cin_pad, Cout_pad)     pointwise weights (bf16, MXU native)
    pw_b_ref : (1, Cout_pad)           pointwise bias
    o_ref    : (1, TH*W_out, Cout_pad) lane-dense output slab
    x_vmem   : (TH_in, Wp, Cin_pad)    scratch for the halo'd row window
    """
    b = pl.program_id(0)
    t = pl.program_id(1)
    TH_in = (TH - 1) * stride + K
    row_start = t * (TH * stride)

    # Manual DMA of just the rows this tile needs (incl. the K-1 row halo).
    cp = pltpu.make_async_copy(x_hbm.at[b, pl.ds(row_start, TH_in)],
                               x_vmem, dma_sem)
    cp.start()
    cp.wait()

    x = x_vmem[...]                             # (TH_in, Wp, Cin_pad)
    cin = x.shape[-1]
    dw_w = dw_w_ref[...].astype(jnp.float32)    # (KK_pad, Cin_pad)

    # ---- depthwise conv: per-tap shifted multiply-accumulate on the VPU ----
    # f32 accumulation (portable across v5e/v6e/v7x; bf16 acc would regress v5e).
    acc = jnp.zeros((TH, W_out, cin), jnp.float32)
    if stride == 1:
        for kh in range(K):
            for kw in range(K):
                patch = x[kh:kh + TH, kw:kw + W_out, :].astype(jnp.float32)
                acc = acc + patch * dw_w[kh * K + kw][None, None, :]
    else:
        # De-interleave the W (sublane) axis ONCE per tile instead of doing a
        # strided sublane slice per tap (K*K XLU relayouts -> `stride` relayouts).
        cols = [x[:, r::stride, :] for r in range(stride)]
        for kh in range(K):
            for kw in range(K):
                q, r = divmod(kw, stride)
                patch = jax.lax.slice(
                    cols[r],
                    (kh, q, 0),
                    (kh + (TH - 1) * stride + 1, q + W_out, cin),
                    (stride, 1, 1),
                ).astype(jnp.float32)
                acc = acc + patch * dw_w[kh * K + kw][None, None, :]
    acc = acc + dw_b_ref[...].astype(jnp.float32)[None]

    # ---- pointwise 1x1 conv: (TH*W_out, Cin_pad) @ (Cin_pad, Cout_pad) on MXU ----
    # bf16 inputs, f32 accumulation.
    hflat = acc.reshape(TH * W_out, cin).astype(mxu_dtype)
    out = jnp.dot(hflat, pw_w_ref[...], preferred_element_type=jnp.float32)
    out = out + pw_b_ref[...].astype(jnp.float32)
    o_ref[0] = out.astype(o_ref.dtype)          # lane-dense (TH*W_out, Cout_pad) store


def depthwise_separable_conv(x_nchw, dw_weight, dw_bias, pw_weight, pw_bias,
                             *, stride=1, padding=0, max_rows_per_tile=None,
                             mxu_dtype=jnp.bfloat16):
    """Forward pass matching PyTorch depthwise Conv2d(groups=Cin) + 1x1 Conv2d.

    x_nchw   : (N, Cin, H, W)
    dw_weight: (Cin, 1, K, K)
    dw_bias  : (Cin,)
    pw_weight: (Cout, Cin, 1, 1)
    pw_bias  : (Cout,)
    returns  : (N, Cout, H_out, W_out)
    """
    N, Cin, H, W = x_nchw.shape
    Cout = pw_weight.shape[0]
    K = dw_weight.shape[-1]
    H_out = (H + 2 * padding - K) // stride + 1
    W_out = (W + 2 * padding - K) // stride + 1
    Hp, Wp = H + 2 * padding, W + 2 * padding

    LANE = 128
    Cin_pad = _round_up(Cin, LANE)
    Cout_pad = _round_up(Cout, LANE)
    KK_pad = _round_up(K * K, 8)

    # ---- glue: layout, padding, weight repacking (not the hot path) ----
    x = jnp.transpose(x_nchw, (0, 2, 3, 1))                      # NCHW -> NHWC
    x = jnp.pad(x, ((0, 0), (padding, padding), (padding, padding),
                    (0, Cin_pad - Cin)))                         # spatial + lane pad

    dw_w = jnp.transpose(dw_weight[:, 0], (1, 2, 0)).reshape(K * K, Cin)
    dw_w = jnp.pad(dw_w, ((0, KK_pad - K * K), (0, Cin_pad - Cin)))
    dw_b = jnp.pad(dw_bias, (0, Cin_pad - Cin)).reshape(1, Cin_pad)
    pw_w = jnp.pad(jnp.transpose(pw_weight[:, :, 0, 0], (1, 0)),
                   ((0, Cin_pad - Cin), (0, Cout_pad - Cout))).astype(mxu_dtype)
    pw_b = jnp.pad(pw_bias, (0, Cout_pad - Cout)).reshape(1, Cout_pad)

    in_itemsize = jnp.dtype(x.dtype).itemsize
    out_itemsize = jnp.dtype(x_nchw.dtype).itemsize

    TH = _pick_row_tile(H_out, W_out, stride, K, Wp, Cin_pad, Cout_pad,
                        in_itemsize, out_itemsize, cap=max_rows_per_tile)
    TH_in = (TH - 1) * stride + K
    num_t = H_out // TH

    tile_bytes = (TH_in * Wp * Cin_pad * in_itemsize
                  + 2 * TH * W_out * Cout_pad * out_itemsize
                  + 3 * TH * W_out * Cin_pad * 4
                  + KK_pad * Cin_pad * 4 + Cin_pad * Cout_pad * 2
                  + 2 * Cout_pad * 4)
    vmem_limit = int(min(max(4 * tile_bytes, 16 * 2**20), 48 * 2**20))

    kernel = functools.partial(_dsconv_kernel, K=K, stride=stride, TH=TH,
                               W_out=W_out, mxu_dtype=mxu_dtype)

    out_flat = pl.pallas_call(
        kernel,
        out_shape=jax.ShapeDtypeStruct((N, H_out * W_out, Cout_pad), x_nchw.dtype),
        grid_spec=pltpu.PrefetchScalarGridSpec(
            num_scalar_prefetch=0,
            grid=(N, num_t),
            in_specs=[
                pl.BlockSpec(memory_space=pl.ANY),                       # x stays in HBM
                pl.BlockSpec((KK_pad, Cin_pad), lambda b, t: (0, 0)),
                pl.BlockSpec((1, Cin_pad), lambda b, t: (0, 0)),
                pl.BlockSpec((Cin_pad, Cout_pad), lambda b, t: (0, 0)),
                pl.BlockSpec((1, Cout_pad), lambda b, t: (0, 0)),
            ],
            out_specs=pl.BlockSpec((1, TH * W_out, Cout_pad),
                                   lambda b, t: (b, t, 0)),
            scratch_shapes=[
                pltpu.VMEM((TH_in, Wp, Cin_pad), x.dtype),
                pltpu.SemaphoreType.DMA,
            ],
        ),
        compiler_params=pltpu.CompilerParams(
            dimension_semantics=("parallel", "parallel"),
            vmem_limit_bytes=vmem_limit,
        ),
    )(x, dw_w, dw_b, pw_w, pw_b)

    # un-pad channels, restore (H, W), back to NCHW (glue)
    out = out_flat[:, :, :Cout].reshape(N, H_out, W_out, Cout)
    return jnp.transpose(out, (0, 3, 1, 2))


def _reference(x_nchw, dw_weight, dw_bias, pw_weight, pw_bias, *, stride, padding):
    """Pure-JAX reference (lax conv) for verification."""
    Cin = x_nchw.shape[1]
    dw = jax.lax.conv_general_dilated(
        x_nchw, dw_weight,
        window_strides=(stride, stride),
        padding=((padding, padding), (padding, padding)),
        dimension_numbers=("NCHW", "OIHW", "NCHW"),
        feature_group_count=Cin,
    ) + dw_bias[None, :, None, None]
    pw = jax.lax.conv_general_dilated(
        dw, pw_weight,
        window_strides=(1, 1),
        padding=((0, 0), (0, 0)),
        dimension_numbers=("NCHW", "OIHW", "NCHW"),
    ) + pw_bias[None, :, None, None]
    return pw


if __name__ == "__main__":
    key = jax.random.PRNGKey(0)

    def make_case(k, N, Cin, Cout, K, H, W):
        ks = jax.random.split(k, 5)
        x = jax.random.normal(ks[0], (N, Cin, H, W), dtype=jnp.float32)
        dw_w = jax.random.normal(ks[1], (Cin, 1, K, K), dtype=jnp.float32) * 0.1
        dw_b = jax.random.normal(ks[2], (Cin,), dtype=jnp.float32) * 0.1
        pw_w = jax.random.normal(ks[3], (Cout, Cin, 1, 1), dtype=jnp.float32) * 0.1
        pw_b = jax.random.normal(ks[4], (Cout,), dtype=jnp.float32) * 0.1
        return x, dw_w, dw_b, pw_w, pw_b

    k1, k2 = jax.random.split(key)

    # case 1: stride 1, padding 1 (16x16 -> 16x16), two row tiles per image
    args1 = make_case(k1, 2, 4, 8, 3, 16, 16)
    out1 = depthwise_separable_conv(*args1, stride=1, padding=1,
                                    max_rows_per_tile=8)
    jax.block_until_ready(out1)
    ref1 = _reference(*args1, stride=1, padding=1)
    assert out1.shape == ref1.shape, (out1.shape, ref1.shape)
    assert jnp.allclose(out1, ref1, atol=5e-3, rtol=5e-3), \
        float(jnp.max(jnp.abs(out1 - ref1)))

    # case 2: stride 2, no padding (33x33 -> 16x16), exercises the hoisted
    # W de-interleave path and multi-tile halo DMA
    args2 = make_case(k2, 2, 6, 10, 3, 33, 33)
    out2 = depthwise_separable_conv(*args2, stride=2, padding=0,
                                    max_rows_per_tile=8)
    jax.block_until_ready(out2)
    ref2 = _reference(*args2, stride=2, padding=0)
    assert out2.shape == ref2.shape, (out2.shape, ref2.shape)
    assert jnp.allclose(out2, ref2, atol=5e-3, rtol=5e-3), \
        float(jnp.max(jnp.abs(out2 - ref2)))

    print("KERNEL_OK")
</pallas_src>

<mosaic_0001>
module attributes {stable_mosaic.version = 11 : i64} {
  func.func @_dsconv_kernel(%arg0: i32, %arg1: i32, %arg2: memref<2x18x18x128xf32, #tpu.memory_space<any>>, %arg3: memref<16x128xf32, #tpu.memory_space<vmem>>, %arg4: memref<1x128xf32, #tpu.memory_space<vmem>>, %arg5: memref<128x128xbf16, #tpu.memory_space<vmem>>, %arg6: memref<1x128xf32, #tpu.memory_space<vmem>>, %arg7: memref<1x128x128xf32, #tpu.memory_space<vmem>>, %arg8: memref<10x18x128xf32, #tpu.memory_space<vmem>>, %arg9: memref<!tpu.dma_semaphore, #tpu.memory_space<semaphore_mem>>) attributes {dimension_semantics = [#tpu.dimension_semantics<parallel>, #tpu.dimension_semantics<parallel>], iteration_bounds = array<i64: 2, 2>, scalar_prefetch = 0 : i64, scratch_operands = 2 : i64, tpu.core_type = #tpu.core_type<tc>, window_params = [{}, {pipeline_mode = #tpu.pipeline_mode<synchronous>, transform_indices = @transform_1, window_bounds = array<i64: 16, 128>}, {pipeline_mode = #tpu.pipeline_mode<synchronous>, transform_indices = @transform_2, window_bounds = array<i64: 1, 128>}, {pipeline_mode = #tpu.pipeline_mode<synchronous>, transform_indices = @transform_3, window_bounds = array<i64: 128, 128>}, {pipeline_mode = #tpu.pipeline_mode<synchronous>, transform_indices = @transform_4, window_bounds = array<i64: 1, 128>}, {transform_indices = @transform_5, window_bounds = array<i64: 1, 128, 128>}]} {
    %c8_i32 = arith.constant 8 : i32
    %0 = arith.muli %arg1, %c8_i32 : i32
    %c0_i32 = arith.constant 0 : i32
    %c0_i32_0 = arith.constant 0 : i32
    %1 = tpu.memref_slice %arg2[%arg0, %0, %c0_i32, %c0_i32_0] : memref<2x18x18x128xf32, #tpu.memory_space<any>> -> memref<1x10x18x128xf32, #tpu.memory_space<any>>
    %2 = tpu.memref_squeeze %1 : memref<1x10x18x128xf32, #tpu.memory_space<any>> -> memref<10x18x128xf32, #tpu.memory_space<any>>
    tpu.enqueue_dma source(%2 : memref<10x18x128xf32, #tpu.memory_space<any>>) target(%arg8 : memref<10x18x128xf32, #tpu.memory_space<vmem>>) target_semaphore(%arg9 : memref<!tpu.dma_semaphore, #tpu.memory_space<semaphore_mem>>)
    %c0_i32_1 = arith.constant 0 : i32
    %c0_i32_2 = arith.constant 0 : i32
    %3 = tpu.memref_slice %arg2[%arg0, %0, %c0_i32_1, %c0_i32_2] : memref<2x18x18x128xf32, #tpu.memory_space<any>> -> memref<1x10x18x128xf32, #tpu.memory_space<any>>
    %4 = tpu.memref_squeeze %3 : memref<1x10x18x128xf32, #tpu.memory_space<any>> -> memref<10x18x128xf32, #tpu.memory_space<any>>
    tpu.wait_dma2 semaphore(%arg9 : memref<!tpu.dma_semaphore, #tpu.memory_space<semaphore_mem>>) src(%4 : memref<10x18x128xf32, #tpu.memory_space<any>>) dst(%arg8 : memref<10x18x128xf32, #tpu.memory_space<vmem>>)
    %c0 = arith.constant 0 : index
    %c0_3 = arith.constant 0 : index
    %c0_4 = arith.constant 0 : index
    %5 = vector.load %arg8[%c0, %c0_3, %c0_4] : memref<10x18x128xf32, #tpu.memory_space<vmem>>, vector<10x18x128xf32>
    %c0_5 = arith.constant 0 : index
    %c0_6 = arith.constant 0 : index
    %6 = vector.load %arg3[%c0_5, %c0_6] : memref<16x128xf32, #tpu.memory_space<vmem>>, vector<16x128xf32>
    %cst = arith.constant 0.000000e+00 : f32
    %7 = vector.broadcast %cst : f32 to vector<8x16x128xf32>
    %8 = vector.extract_strided_slice %5 {offsets = [0, 0, 0], sizes = [8, 16, 128], strides = [1, 1, 1]} : vector<10x18x128xf32> to vector<8x16x128xf32>
    %9 = vector.extract_strided_slice %6 {offsets = [0, 0], sizes = [1, 128], strides = [1, 1]} : vector<16x128xf32> to vector<1x128xf32>
    %10 = vector.shape_cast %9 : vector<1x128xf32> to vector<128xf32>
    %11 = vector.shape_cast %10 : vector<128xf32> to vector<1x1x128xf32>
    %12 = vector.broadcast %11 : vector<1x1x128xf32> to vector<8x16x128xf32>
    %13 = arith.mulf %8, %12 : vector<8x16x128xf32>
    %14 = arith.addf %7, %13 : vector<8x16x128xf32>
    %15 = vector.extract_strided_slice %5 {offsets = [0, 1, 0], sizes = [8, 16, 128], strides = [1, 1, 1]} : vector<10x18x128xf32> to vector<8x16x128xf32>
    %16 = vector.extract_strided_slice %6 {offsets = [1, 0], sizes = [1, 128], strides = [1, 1]} : vector<16x128xf32> to vector<1x128xf32>
    %17 = vector.shape_cast %16 : vector<1x128xf32> to vector<128xf32>
    %18 = vector.shape_cast %17 : vector<128xf32> to vector<1x1x128xf32>
    %19 = vector.broadcast %18 : vector<1x1x128xf32> to vector<8x16x128xf32>
    %20 = arith.mulf %15, %19 : vector<8x16x128xf32>
    %21 = arith.addf %14, %20 : vector<8x16x128xf32>
    %22 = vector.extract_strided_slice %5 {offsets = [0, 2, 0], sizes = [8, 16, 128], strides = [1, 1, 1]} : vector<10x18x128xf32> to vector<8x16x128xf32>
    %23 = vector.extract_strided_slice %6 {offsets = [2, 0], sizes = [1, 128], strides = [1, 1]} : vector<16x128xf32> to vector<1x128xf32>
    %24 = vector.shape_cast %23 : vector<1x128xf32> to vector<128xf32>
    %25 = vector.shape_cast %24 : vector<128xf32> to vector<1x1x128xf32>
    %26 = vector.broadcast %25 : vector<1x1x128xf32> to vector<8x16x128xf32>
    %27 = arith.mulf %22, %26 : vector<8x16x128xf32>
    %28 = arith.addf %21, %27 : vector<8x16x128xf32>
    %29 = vector.extract_strided_slice %5 {offsets = [1, 0, 0], sizes = [8, 16, 128], strides = [1, 1, 1]} : vector<10x18x128xf32> to vector<8x16x128xf32>
    %30 = vector.extract_strided_slice %6 {offsets = [3, 0], sizes = [1, 128], strides = [1, 1]} : vector<16x128xf32> to vector<1x128xf32>
    %31 = vector.shape_cast %30 : vector<1x128xf32> to vector<128xf32>
    %32 = vector.shape_cast %31 : vector<128xf32> to vector<1x1x128xf32>
    %33 = vector.broadcast %32 : vector<1x1x128xf32> to vector<8x16x128xf32>
    %34 = arith.mulf %29, %33 : vector<8x16x128xf32>
    %35 = arith.addf %28, %34 : vector<8x16x128xf32>
    %36 = vector.extract_strided_slice %5 {offsets = [1, 1, 0], sizes = [8, 16, 128], strides = [1, 1, 1]} : vector<10x18x128xf32> to vector<8x16x128xf32>
    %37 = vector.extract_strided_slice %6 {offsets = [4, 0], sizes = [1, 128], strides = [1, 1]} : vector<16x128xf32> to vector<1x128xf32>
    %38 = vector.shape_cast %37 : vector<1x128xf32> to vector<128xf32>
    %39 = vector.shape_cast %38 : vector<128xf32> to vector<1x1x128xf32>
    %40 = vector.broadcast %39 : vector<1x1x128xf32> to vector<8x16x128xf32>
    %41 = arith.mulf %36, %40 : vector<8x16x128xf32>
    %42 = arith.addf %35, %41 : vector<8x16x128xf32>
    %43 = vector.extract_strided_slice %5 {offsets = [1, 2, 0], sizes = [8, 16, 128], strides = [1, 1, 1]} : vector<10x18x128xf32> to vector<8x16x128xf32>
    %44 = vector.extract_strided_slice %6 {offsets = [5, 0], sizes = [1, 128], strides = [1, 1]} : vector<16x128xf32> to vector<1x128xf32>
    %45 = vector.shape_cast %44 : vector<1x128xf32> to vector<128xf32>
    %46 = vector.shape_cast %45 : vector<128xf32> to vector<1x1x128xf32>
    %47 = vector.broadcast %46 : vector<1x1x128xf32> to vector<8x16x128xf32>
    %48 = arith.mulf %43, %47 : vector<8x16x128xf32>
    %49 = arith.addf %42, %48 : vector<8x16x128xf32>
    %50 = vector.extract_strided_slice %5 {offsets = [2, 0, 0], sizes = [8, 16, 128], strides = [1, 1, 1]} : vector<10x18x128xf32> to vector<8x16x128xf32>
    %51 = vector.extract_strided_slice %6 {offsets = [6, 0], sizes = [1, 128], strides = [1, 1]} : vector<16x128xf32> to vector<1x128xf32>
    %52 = vector.shape_cast %51 : vector<1x128xf32> to vector<128xf32>
    %53 = vector.shape_cast %52 : vector<128xf32> to vector<1x1x128xf32>
    %54 = vector.broadcast %53 : vector<1x1x128xf32> to vector<8x16x128xf32>
    %55 = arith.mulf %50, %54 : vector<8x16x128xf32>
    %56 = arith.addf %49, %55 : vector<8x16x128xf32>
    %57 = vector.extract_strided_slice %5 {offsets = [2, 1, 0], sizes = [8, 16, 128], strides = [1, 1, 1]} : vector<10x18x128xf32> to vector<8x16x128xf32>
    %58 = vector.extract_strided_slice %6 {offsets = [7, 0], sizes = [1, 128], strides = [1, 1]} : vector<16x128xf32> to vector<1x128xf32>
    %59 = vector.shape_cast %58 : vector<1x128xf32> to vector<128xf32>
    %60 = vector.shape_cast %59 : vector<128xf32> to vector<1x1x128xf32>
    %61 = vector.broadcast %60 : vector<1x1x128xf32> to vector<8x16x128xf32>
    %62 = arith.mulf %57, %61 : vector<8x16x128xf32>
    %63 = arith.addf %56, %62 : vector<8x16x128xf32>
    %64 = vector.extract_strided_slice %5 {offsets = [2, 2, 0], sizes = [8, 16, 128], strides = [1, 1, 1]} : vector<10x18x128xf32> to vector<8x16x128xf32>
    %65 = vector.extract_strided_slice %6 {offsets = [8, 0], sizes = [1, 128], strides = [1, 1]} : vector<16x128xf32> to vector<1x128xf32>
    %66 = vector.shape_cast %65 : vector<1x128xf32> to vector<128xf32>
    %67 = vector.shape_cast %66 : vector<128xf32> to vector<1x1x128xf32>
    %68 = vector.broadcast %67 : vector<1x1x128xf32> to vector<8x16x128xf32>
    %69 = arith.mulf %64, %68 : vector<8x16x128xf32>
    %70 = arith.addf %63, %69 : vector<8x16x128xf32>
    %c0_7 = arith.constant 0 : index
    %c0_8 = arith.constant 0 : index
    %71 = vector.load %arg4[%c0_7, %c0_8] : memref<1x128xf32, #tpu.memory_space<vmem>>, vector<1x128xf32>
    %72 = vector.shape_cast %71 : vector<1x128xf32> to vector<1x1x128xf32>
    %73 = vector.broadcast %72 : vector<1x1x128xf32> to vector<8x16x128xf32>
    %74 = arith.addf %70, %73 : vector<8x16x128xf32>
    %75 = vector.shape_cast %74 : vector<8x16x128xf32> to vector<128x128xf32>
    %76 = arith.truncf %75 : vector<128x128xf32> to vector<128x128xbf16>
    %c0_9 = arith.constant 0 : index
    %c0_10 = arith.constant 0 : index
    %77 = vector.load %arg5[%c0_9, %c0_10] : memref<128x128xbf16, #tpu.memory_space<vmem>>, vector<128x128xbf16>
    %cst_11 = arith.constant dense<0.000000e+00> : vector<128x128xf32>
    %78 = tpu.matmul %76, %77, %cst_11 {dimension_numbers = #tpu.dot_dimension_numbers<[1], [0], [0], [1], [0, 0, 1, 1], [], []>} : vector<128x128xbf16>, vector<128x128xbf16>, vector<128x128xf32> -> vector<128x128xf32>
    %c0_12 = arith.constant 0 : index
    %c0_13 = arith.constant 0 : index
    %79 = vector.load %arg6[%c0_12, %c0_13] : memref<1x128xf32, #tpu.memory_space<vmem>>, vector<1x128xf32>
    %80 = vector.broadcast %79 : vector<1x128xf32> to vector<128x128xf32>
    %81 = arith.addf %78, %80 : vector<128x128xf32>
    %c0_14 = arith.constant 0 : index
    %c0_15 = arith.constant 0 : index
    %c0_16 = arith.constant 0 : index
    %82 = vector.load %arg7[%c0_14, %c0_15, %c0_16] : memref<1x128x128xf32, #tpu.memory_space<vmem>>, vector<1x128x128xf32>
    %83 = vector.shape_cast %82 : vector<1x128x128xf32> to vector<128x128xf32>
    %84 = vector.shape_cast %81 : vector<128x128xf32> to vector<1x128x128xf32>
    tpu.vector_store %arg7[%c0_14, %c0_15, %c0_16], %84 {strides = array<i32>} : memref<1x128x128xf32, #tpu.memory_space<vmem>>, vector<1x128x128xf32>,
    return
  }
  func.func @transform_1(%arg0: i32, %arg1: i32) -> (i32, i32) {
    %c0_i32 = arith.constant 0 : i32
    %c0_i32_0 = arith.constant 0 : i32
    %c0_i32_1 = arith.constant 0 : i32
    return %c0_i32, %c0_i32_0 : i32, i32
  }
  func.func @transform_2(%arg0: i32, %arg1: i32) -> (i32, i32) {
    %c0_i32 = arith.constant 0 : i32
    %c0_i32_0 = arith.constant 0 : i32
    %c0_i32_1 = arith.constant 0 : i32
    return %c0_i32, %c0_i32_0 : i32, i32
  }
  func.func @transform_3(%arg0: i32, %arg1: i32) -> (i32, i32) {
    %c0_i32 = arith.constant 0 : i32
    %c0_i32_0 = arith.constant 0 : i32
    %c0_i32_1 = arith.constant 0 : i32
    return %c0_i32, %c0_i32_0 : i32, i32
  }
  func.func @transform_4(%arg0: i32, %arg1: i32) -> (i32, i32) {
    %c0_i32 = arith.constant 0 : i32
    %c0_i32_0 = arith.constant 0 : i32
    %c0_i32_1 = arith.constant 0 : i32
    return %c0_i32, %c0_i32_0 : i32, i32
  }
  func.func @transform_5(%arg0: i32, %arg1: i32) -> (i32, i32, i32) {
    %c0_i32 = arith.constant 0 : i32
    %c0_i32_0 = arith.constant 0 : i32
    return %arg0, %arg1, %c0_i32 : i32, i32, i32
  }
}

</mosaic_0001>

<bundles_post_ra>
// kernel: tpu_custom_call.1
= control target key start
LH: loop header
LB: loop body
LE: loop exit
PB: predicated region body
PF: predicated region fallthrough
CT: control target
= control target key end

     0   :  { %10 = vsyncpa [#allocation5], 0  ;;  %s2654_s0 = inlined_call_operand.vmem [shape: f32[2,18,18,128], index: 0, kind: input, shape index: {}]   ;;  %s2655_s1 = inlined_call_operand.vmem [shape: f32[16,128], index: 1, kind: input, shape index: {}]   ;;  %s2656_s2 = inlined_call_operand.vmem [shape: f32[1,128], index: 2, kind: input, shape index: {}]   ;;  %s2657_s3 = inlined_call_operand.vmem [shape: bf16[128,128], index: 3, kind: input, shape index: {}]   ;;  %s2658_s4 = inlined_call_operand.vmem [shape: f32[1,128], index: 4, kind: input, shape index: {}]   ;;  %s2659_s5 = inlined_call_operand.hbm [shape: f32[2,256,128], index: 5, kind: output, shape index: {}]  }
   0x1   :  { %12 = vsyncpa [#allocation5 + $0x1], 0  ;;  %s1846_s18 = smov 0   ;;  %s1848_s19 = smov 0  }
   0x2   :  { %s1850_s20 = smov 0   ;;  %s1852_s21 = smov 0  }
   0x3   :  { %s1854_s22 = smov 0   ;;  %s1856_s23 = smov 0  }
   0x4   :  { %s1858_s24 = smov 0   ;;  %s1860_s25 = smov 0  }
   0x5 LB: > { %s1537_s26 = sadd.s32 4294967295, %s1811_s25   ;;  %s1538_s27 = sadd.s32 4294967294, %s1811_s25   ;;  %s1811_s25 = sphi %s1860_s25, %s18_s25   ;;  %s1807_s24 = sphi %s1858_s24, %s2668_s24   ;;  %s1803_s23 = sphi %s1856_s23, %s2667_s23   ;;  %s1799_s22 = sphi %s1854_s22, %s2666_s22   ;;  %s1795_s21 = sphi %s1852_s21, %s2665_s21   ;;  %s1791_s20 = sphi %s1850_s20, %s2664_s20   ;;  %s1787_s19 = sphi %s1848_s19, %s2663_s19   ;;  %s1783_s18 = sphi %s1846_s18, %s2662_s18  }
   0x6   : > { %s27_s28 = sadd.s32 1, %s1803_s23  ;;  %s30_s29 = sadd.s32 1, %s1807_s24 }
   0x7   : > { %p28_p0 = scmp.ge.s32.totalorder %s27_s28, 2  ;;  %p133_p1 = scmp.ne.s32.totalorder %s1791_s20, %s1787_s19 }
   0x8   : > { %p134_p2 = scmp.eq.s32.totalorder %s1537_s26, 3  ;;  %p139_p5 = scmp.ne.s32.totalorder %s1787_s19, %s1783_s18 }
   0x9   : > { %s2670_s28 = smov (%p28_p0, %s27_s28), 0  ;;  %s2672_s29 = smov (!%p28_p0, %s30_s29), %s1807_s24 }
   0xa   : > { %s119_s30 = ssub.s32 %s1803_s23, %s2670_s28  ;;  %p1897_p3 = por %p134_p2, %p133_p1 }
   0xb   : > { %p32_p4 = scmp.ge.s32.totalorder %s2672_s29, 2  ;;  %p140_p6 = scmp.eq.s32.totalorder %s1538_s27, 3 }
   0xc   : > { %p1540_p7 = scmp.ge.s32.totalorder %s1811_s25, 1  ;;  %p170_p9 = scmp.lt.s32.totalorder %s1811_s25, 5 }
   0xd   : > { %s2674_s29 = smov (%p32_p4, %s2672_s29), 0  ;;  %p1906_p8 = por %p140_p6, %p139_p5 }
   0xe   : > { %s118_s8 = ssub.s32 %s1807_s24, %s2674_s29  ;;  %s123_s9 = sadd.s32 1, %s1791_s20 }
   0xf   : > { %s120_s10 = sor.u32 %s119_s30, %s118_s8  ;;  %p171_p10 = pnand %p1540_p7, %p170_p9 }
  0x10   : > { %p121_p11 = scmp.eq.s32.totalorder %s120_s10, 0  ;;  %s188_s12 = sand.u32 (!%p171_p10), 1, %s1787_s19  }
  0x11   : > { %174 = sbr.rel (%p171_p10) target bundleno = 419 (0x1a3), region = 36  ;;  %s1921_s14 = sshll.u32 (!%p171_p10), %s188_s12, 7 }
  0x12   : > { %s1915_s11 = scalar_select %p121_p11, %s1791_s20, %s123_s9  }
  0x13   : > { %s1543_s13 = smul.u32 (!%p171_p10), 192, %s1795_s21  ;;  %s1960_s30 = scalar_lea.vmem (!%p171_p10), [#allocation4], %s1921_s14 }
  0x14   : > { %s195_s15 = smul.u32 (!%p171_p10), 432, %s1799_s22 }
  0x16   : > { %s196_s16 = sadd.s32 %s1543_s13, %s195_s15 }
  0x17   : > { %s1927_s27 = scalar_lea.vmem %s2654_s0, %s196_s16 }
  0x18   : > { %v254_v0 = vld [vmem:[%s1927_s27] sm:$0xff]  ;;  %v256_v1 = vld [vmem:[%s1927_s27 + $0x8] sm:$0xff]  ;;  %v258_v2 = vld [vmem:[%s1927_s27 + $0x18] sm:$0xff] }
  0x19   : > { %255 = vst [vmem:[#allocation2 + $0x40] sm:$0xff] %v254_v0  ;;  %257 = vst [vmem:[#allocation2] sm:$0xff] %v256_v1  ;;  %v260_v3 = vld [vmem:[%s1927_s27 + $0x20] sm:$0xff]  ;;  %v262_v4 = vld [vmem:[%s1927_s27 + $0x30] sm:$0xff] }
  0x1a   : > { %259 = vst [vmem:[#allocation2 + $0xb8] sm:$0xff] %v258_v2  ;;  %v264_v5 = vld [vmem:[%s1927_s27 + $0x38] sm:$0xff]  ;;  %261 = vst [vmem:[#allocation2 + $0x20] sm:$0xff] %v260_v3  ;;  %v266_v6 = vld [vmem:[%s1927_s27 + $0x48] sm:$0xff] }
  0x1b   : > { %263 = vst [vmem:[#allocation2 + $0x78] sm:$0xff] %v262_v4  ;;  %265 = vst [vmem:[#allocation2 + $0x98] sm:$0xff] %v264_v5  ;;  %v268_v7 = vld [vmem:[%s1927_s27 + $0x50] sm:$0xff]  ;;  %v270_v8 = vld [vmem:[%s1927_s27 + $0x60] sm:$0xff] }
  0x1c   : > { %267 = vst [vmem:[#allocation2 + $0x48] sm:$0xff] %v266_v6  ;;  %269 = vst [vmem:[#allocation2 + $0x68] sm:$0xff] %v268_v7  ;;  %v272_v9 = vld [vmem:[%s1927_s27 + $0x68] sm:$0xff]  ;;  %v274_v10 = vld [vmem:[%s1927_s27 + $0x78] sm:$0xff] }
  0x1d   : > { %271 = vst [vmem:[#allocation2 + $0xc0] sm:$0xff] %v270_v8  ;;  %v276_v11 = vld [vmem:[%s1927_s27 + $0x80] sm:$0xff]  ;;  %273 = vst [vmem:[#allocation2 + $0xc8] sm:$0xff] %v272_v9  ;;  %v278_v12 = vld [vmem:[%s1927_s27 + $0x90] sm:$0xff] }
  0x1e   : > { %275 = vst [vmem:[#allocation2 + $0xe8] sm:$0xff] %v274_v10  ;;  %277 = vst [vmem:[#allocation2 + $0x58] sm:$0xff] %v276_v11  ;;  %v280_v13 = vld [vmem:[%s1927_s27 + $0x98] sm:$0xff]  ;;  %v282_v14 = vld [vmem:[%s1927_s27 + $0xa8] sm:$0xff] }
  0x1f   : > { %279 = vst [vmem:[#allocation2 + $0x90] sm:$0xff] %v278_v12  ;;  %281 = vst [vmem:[#allocation2 + $0x28] sm:$0xff] %v280_v13  ;;  %v284_v15 = vld [vmem:[%s1927_s27 + $0xb0] sm:$0xff]  ;;  %v286_v16 = vld [vmem:[%s1927_s27 + $0xc0] sm:$0xff] }
  0x20   : > { %283 = vst [vmem:[#allocation2 + $0xa8] sm:$0xff] %v282_v14  ;;  %v288_v17 = vld [vmem:[%s1927_s27 + $0xc8] sm:$0xff]  ;;  %285 = vst [vmem:[#allocation2 + $0x60] sm:$0xff] %v284_v15  ;;  %v290_v18 = vld [vmem:[%s1927_s27 + $0xd8] sm:$0xff] }
  0x21   : > { %287 = vst [vmem:[#allocation2 + $0x8] sm:$0xff] %v286_v16  ;;  %289 = vst [vmem:[#allocation2 + $0xb0] sm:$0xff] %v288_v17  ;;  %v292_v19 = vld [vmem:[%s1927_s27 + $0xe0] sm:$0xff]  ;;  %v1544_v20 = vld [vmem:[%s1927_s27 + $0x10] sm:$0x3] }
  0x22   : > { %291 = vst [vmem:[#allocation2 + $0x70] sm:$0xff] %v290_v18  ;;  %293 = vst [vmem:[#allocation2 + $0x18] sm:$0xff] %v292_v19  ;;  %v1545_v21 = vld [vmem:[%s1927_s27 + $0x28] sm:$0x3]  ;;  %v1546_v22 = vld [vmem:[%s1927_s27 + $0x40] sm:$0x3] }
  0x23   : > { %305 = vst [vmem:[#allocation2 + $0x50] sm:$0x3] %v1544_v20  ;;  %v1547_v23 = vld [vmem:[%s1927_s27 + $0x58] sm:$0x3]  ;;  %307 = vst [vmem:[#allocation2 + $0x38] sm:$0x3] %v1545_v21 }
  0x24   : > { %309 = vst [vmem:[#allocation2 + $0xd8] sm:$0x3] %v1546_v22  ;;  %311 = vst [vmem:[#allocation2 + $0x10] sm:$0x3] %v1547_v23  ;;  %v1548_v24 = vld [vmem:[%s1927_s27 + $0x70] sm:$0x3] }
  0x25   : > { %v1549_v25 = vld [vmem:[%s1927_s27 + $0x88] sm:$0x3]  ;;  %v1550_v26 = vld [vmem:[%s1927_s27 + $0xa0] sm:$0x3]  ;;  %313 = vst [vmem:[#allocation2 + $0x80] sm:$0x3] %v1548_v24 }
  0x26   : > { %315 = vst [vmem:[#allocation2 + $0xa0] sm:$0x3] %v1549_v25  ;;  %317 = vst [vmem:[#allocation2 + $0xe0] sm:$0x3] %v1550_v26  ;;  %v1551_v27 = vld [vmem:[%s1927_s27 + $0xb8] sm:$0x3] }
  0x27   : > { %v1552_v28 = vld [vmem:[%s1927_s27 + $0xd0] sm:$0x3]  ;;  %v1553_v29 = vld [vmem:[%s1927_s27 + $0xe8] sm:$0x3]  ;;  %319 = vst [vmem:[#allocation2 + $0x88] sm:$0x3] %v1551_v27 }
  0x28   : > { %321 = vst [vmem:[#allocation2 + $0xd0] sm:$0x3] %v1552_v28  ;;  %323 = vst [vmem:[#allocation2 + $0x30] sm:$0x3] %v1553_v29 }
  0x29   : > { %327 = vsyncadd [#allocation3], 2880 }
  0x2a   : > { %1775 = dma.done.wait [#allocation3], 2880 }
  0x2b   : > { %1776 = vsyncadd [#allocation3], 4294964416  ;;  %v1708_v30 = vld [vmem:[%s2657_s3 + $0x38] sm:$0xff]   ;;  %v364_v31 = vlaneseq  ;;  %v1709_v32 = vld [vmem:[%s2657_s3 + $0x30] sm:$0xff]   ;;  %vm452_vm0 = vcmask 1046528   ;;  %vm577_vm1 = vcmask 1045504  }
  0x2c   : > { %1587 = vmatprep.subr.bf16.mxu0 %v1708_v30  ;;  %1619 = vmatprep.subr.bf16.mxu1 %v1708_v30  ;;  %v1710_v33 = vld [vmem:[%s2657_s3 + $0x28] sm:$0xff]   ;;  %v1711_v35 = vld [vmem:[%s2657_s3 + $0x20] sm:$0xff]   ;;  %v1712_v46 = vld [vmem:[%s2657_s3 + $0x18] sm:$0xff]   ;;  %s1565_s16 = sshll.u32 %s1795_s21, 4  ;;  %s1566_s17 = sshll.u32 %s1799_s22, 5 }
  0x2d   : > { %1588 = vmatpush3.bf16.msra.mxu0 %v1708_v30  ;;  %1627 = vmatpush3.bf16.msra.mxu1 %v1708_v30  ;;  %v1971_v34 = vshrl.u32 %v364_v31, 7  ;;  %v332_v43 = vld [vmem:[#allocation2 + $0x40] sm:$0xff]  ;;  %v334_v47 = vld [vmem:[#allocation2 + $0x50] sm:$0x3]  ;;  %v337_v54 = vld [vmem:[#allocation2 + $0x38] sm:$0x3]  ;;  %s1446_s26 = sadd.s32 %s1566_s17, %s1565_s16 }
  0x2e   : > { %1589 = vmatprep.subr.bf16.mxu0 %v1709_v32  ;;  %1620 = vmatprep.subr.bf16.mxu1 %v1709_v32  ;;  %v333_v44 = vld [vmem:[#allocation2] sm:$0xff]  ;;  %v1713_v62 = vld [vmem:[%s2657_s3 + $0x10] sm:$0xff]   ;;  %v2025_v3 = vld [vmem:[#allocation2 + $0xb8] sm:$0xff]  ;;  %s1567_s27 = sshll.u32 %s1446_s26, 7  ;;  %s1449_s8 = sshll.u32 %s1960_s30, 4  ;;  %s2597_s8 = int_to_ptr.vmem [resolvable:$true] %s1449_s8 }
  0x2f   : > { %v366_v36 = vsub.s32 0, %v1971_v34  ;;  %v402_v37 = vsub.s32 1, %v1971_v34  ;;  %v527_v38 = vsub.s32 2, %v1971_v34  ;;  %v652_v39 = vsub.s32 3, %v1971_v34  ;;  %v1986_v45 = vld [vmem:[%s2655_s1] sm:$0xff]  ;;  %v1714_v16 = vld [vmem:[%s2657_s3 + $0x8] sm:$0xff]   ;;  %s2595_s21 = scalar_lea.hbm %s2659_s5, %s1567_s27 }
  0x30   : > { %v688_v40 = vsub.s32 4, %v1971_v34  ;;  %v812_v41 = vsub.s32 5, %v1971_v34  ;;  %v936_v42 = vsub.s32 6, %v1971_v34  ;;  %v2033_v8 = vld [vmem:[#allocation2 + $0x20] sm:$0xff]  ;;  %v972_v20 = vsub.s32 7, %v1971_v34  ;;  %s2603_s22 = scalar_lea.sflag [#allocation5], %s188_s12 }
  0x31   : > { %1590 = vmatpush3.bf16.msra.mxu0 %v1709_v32  ;;  %1628 = vmatpush3.bf16.msra.mxu1 %v1709_v32  ;;  %v1994_v48 = vrot.slane %v1986_v45, %v366_v36  ;;  %v1997_v49 = vrot.slane %v1986_v45, %v402_v37  ;;  %v2000_v50 = vrot.slane %v1986_v45, %v527_v38  ;;  %v1715_v29 = vld [vmem:[%s2657_s3] sm:$0xff]   ;;  %v2062_v37 = vld [vmem:[#allocation2 + $0x98] sm:$0xff]  ;;  %v363_v38 = vld [vmem:[%s2655_s1 + $0x8] sm:$0xff]  ;;  %s1717_s13 = scalar_lea.vmem %s2597_s8, 2048  ;;  %s1813_s14 = smov [#allocation4]  }
  0x32   : > { %1591 = vmatprep.subr.bf16.mxu0 %v1710_v33  ;;  %1621 = vmatprep.subr.bf16.mxu1 %v1710_v33  ;;  %v2003_v51 = vrot.slane %v1986_v45, %v652_v39  ;;  %v2006_v52 = vrot.slane %v1986_v45, %v688_v40  ;;  %v2009_v53 = vrot.slane %v1986_v45, %v812_v41  ;;  %p1718_p12 = scmp.ne.s32.totalorder %s2597_s8, %s1717_s13  ;;  %s1721_s15 = sshll.u32 %s1813_s14, 4  ;;  %s1722_s15 = int_to_ptr.vmem [resolvable:$false] %s1721_s15 }
  0x33   : > { %v368_v55 = vmul.f32 %v1994_v48, %v332_v43  ;;  %v404_v56 = vmul.f32 %v1997_v49, %v332_v43  ;;  %v405_v57 = vmul.f32 %v1997_v49, %v333_v44  ;;  %v2015_v58 = vrot.slane %v1986_v45, %v936_v42  ;;  %s1723_s16 = scalar_lea.vmem %s1722_s15, 4096  ;;  %p1724_p1 = scmp.lt.s32.totalorder %s2597_s8, %s1722_s15 }
  0x34   : > { %v369_v59 = vmul.f32 %v1994_v48, %v333_v44  ;;  %v406_v60 = vmul.f32 %v1997_v49, %v334_v47  ;;  %v529_v61 = vmul.f32 %v2000_v50, %v332_v43  ;;  %v530_v1 = vmul.f32 %v2000_v50, %v333_v44  ;;  %p1719_p13 = pnand %p1718_p12, %p1897_p3  ;;  %p1725_p2 = scmp.lt.s32.totalorder %s1723_s16, %s1717_s13 }
  0x35   : > { %1592 = vmatpush3.bf16.msra.mxu0 %v1710_v33  ;;  %1629 = vmatpush3.bf16.msra.mxu1 %v1710_v33  ;;  %v453_v63 = vrot.slane %v404_v56, 1  ;;  %v454_v0 = vrot.slane %v405_v57, 1  ;;  %v531_v2 = vmul.f32 %v2000_v50, %v334_v47  ;;  %v2028_v4 = vmul.f32 %v1997_v49, %v337_v54 }
  0x36   : > { %1593 = vmatprep.subr.bf16.mxu0 %v1711_v35  ;;  %1622 = vmatprep.subr.bf16.mxu1 %v1711_v35  ;;  %v456_v5 = vrot.slane %v406_v60, 1  ;;  %v2031_v6 = vmul.f32 %v2000_v50, %v337_v54  ;;  %v578_v7 = vrot.slane %v529_v61, 2  ;;  %v579_v10 = vrot.slane %v530_v1, 2  ;;  %v2089_v1 = vld [vmem:[#allocation2 + $0xd8] sm:$0x3]  ;;  %p1720_p0 = pneg %p1719_p13  ;;  %p1726_p4 = por %p1725_p2, %p1724_p1 }
  0x37   : > { %v455_v9 = vsel %vm452_vm0, %v453_v63, %v454_v0  ;;  %v581_v11 = vrot.slane %v531_v2, 2  ;;  %v654_v12 = vmul.f32 %v2003_v51, %v2025_v3  ;;  %v655_v15 = vmul.f32 %v2003_v51, %v2033_v8  ;;  %v2085_v63 = vld [vmem:[#allocation2 + $0xc8] sm:$0xff] }
  0x38   : > { %v457_v13 = vsel %vm452_vm0, %v454_v0, %v456_v5  ;;  %v509_v14 = vadd.f32 %v455_v9, %v368_v55  ;;  %v580_v18 = vsel %vm577_vm1, %v578_v7, %v579_v10  ;;  %v690_v22 = vmul.f32 %v2006_v52, %v2025_v3  ;;  %p1727_p5 = pnand %p1726_p4, %p1720_p0 }
  0x39   : > { %1594 = vmatpush3.bf16.msra.mxu0 %v1711_v35  ;;  %1630 = vmatpush3.bf16.msra.mxu1 %v1711_v35  ;;  %v510_v17 = vadd.f32 %v457_v13, %v369_v59  ;;  %v582_v19 = vsel %vm577_vm1, %v579_v10, %v581_v11  ;;  %v691_v23 = vmul.f32 %v2006_v52, %v2033_v8  ;;  %v2060_v35 = vld [vmem:[#allocation2 + $0x78] sm:$0xff]  ;;  %v2075_v59 = vld [vmem:[#allocation2 + $0xc0] sm:$0xff]  ;;  %v461_v60 = vrot.slane %v2028_v4, 1 }
  0x3a   : > { %1595 = vmatprep.subr.bf16.mxu0 %v1712_v46  ;;  %1623 = vmatprep.subr.bf16.mxu1 %v1712_v46  ;;  %v634_v21 = vadd.f32 %v580_v18, %v509_v14  ;;  %v692_v24 = vmul.f32 %v2006_v52, %v337_v54  ;;  %v814_v26 = vmul.f32 %v2009_v53, %v2025_v3  ;;  %v738_v31 = vrot.slane %v690_v22, 1 }
  0x3b   : > { %v635_v25 = vadd.f32 %v582_v19, %v510_v17  ;;  %v815_v27 = vmul.f32 %v2009_v53, %v2033_v8  ;;  %v816_v28 = vmul.f32 %v2009_v53, %v337_v54  ;;  %v739_v32 = vrot.slane %v691_v23, 1 }
  0x3c   : > { %v670_v30 = vadd.f32 %v654_v12, %v634_v21  ;;  %v741_v33 = vrot.slane %v692_v24, 1  ;;  %v862_v40 = vrot.slane %v814_v26, 2  ;;  %v939_v47 = vmul.f32 %v2015_v58, %v2062_v37 }
  0x3d   : > { %1596 = vmatpush3.bf16.msra.mxu0 %v1712_v46  ;;  %1631 = vmatpush3.bf16.msra.mxu1 %v1712_v46  ;;  %v671_v39 = vadd.f32 %v655_v15, %v635_v25  ;;  %v863_v41 = vrot.slane %v815_v27, 2  ;;  %v865_v42 = vrot.slane %v816_v28, 2  ;;  %v740_v43 = vsel %vm452_vm0, %v738_v31, %v739_v32  ;;  %v2106_v15 = vld [vmem:[#allocation2 + $0x80] sm:$0x3] }
  0x3e   : > { %1597 = vmatprep.subr.bf16.mxu0 %v1713_v62  ;;  %1624 = vmatprep.subr.bf16.mxu1 %v1713_v62  ;;  %v742_v44 = vsel %vm452_vm0, %v739_v32, %v741_v33  ;;  %v938_v46 = vmul.f32 %v2015_v58, %v2060_v35  ;;  %v794_v54 = vadd.f32 %v740_v43, %v670_v30  ;;  %v586_v2 = vrot.slane %v2031_v6, 2  ;;  %v2123_v32 = vld [vmem:[%s2656_s2] ss:$0 sm:$0xff]  ;;  %v2127_v43 = vld [vmem:[#allocation2 + $0xe8] sm:$0xff] }
  0x3f   : > { %v795_v55 = vadd.f32 %v742_v44, %v671_v39  ;;  %v864_v56 = vsel %vm577_vm1, %v862_v40, %v863_v41  ;;  %v866_v57 = vsel %vm577_vm1, %v863_v41, %v865_v42  ;;  %v2079_v61 = vrot.slane %v1986_v45, %v972_v20 }
  0x40   : > { %v376_v0 = vmul.f32 %v1994_v48, %v2075_v59  ;;  %v918_v5 = vadd.f32 %v864_v56, %v794_v54  ;;  %v377_v45 = vmul.f32 %v1994_v48, %v2085_v63  ;;  %v416_v22 = vmul.f32 %v1997_v49, %v2075_v59 }
  0x41   : > { %1598 = vmatpush3.bf16.msra.mxu0 %v1713_v62  ;;  %1632 = vmatpush3.bf16.msra.mxu1 %v1713_v62  ;;  %v2083_v62 = vrot.slane %v363_v38, %v366_v36  ;;  %v919_v7 = vadd.f32 %v866_v57, %v795_v55  ;;  %v974_v34 = vmul.f32 %v2079_v61, %v2060_v35 }
  0x42   : > { %1599 = vmatprep.subr.bf16.mxu0 %v1714_v16  ;;  %1625 = vmatprep.subr.bf16.mxu1 %v1714_v16  ;;  %v975_v36 = vmul.f32 %v2079_v61, %v2062_v37  ;;  %v976_v9 = vmul.f32 %v2079_v61, %v2089_v1  ;;  %v954_v11 = vadd.f32 %v938_v46, %v918_v5  ;;  %v473_v33 = vrot.slane %v416_v22, 1 }
  0x43   : > { %v1098_v10 = vmul.f32 %v2083_v62, %v2060_v35  ;;  %v955_v12 = vadd.f32 %v939_v47, %v919_v7  ;;  %v1099_v13 = vmul.f32 %v2083_v62, %v2062_v37  ;;  %v1100_v14 = vmul.f32 %v2083_v62, %v2089_v1  ;;  %v2137_v7 = vld [vmem:[#allocation2 + $0x58] sm:$0xff] }
  0x44   : > { %v1023_v17 = vrot.slane %v975_v36, 1  ;;  %v1025_v18 = vrot.slane %v976_v9, 1  ;;  %v417_v23 = vmul.f32 %v1997_v49, %v2085_v63  ;;  %v418_v26 = vmul.f32 %v1997_v49, %v2106_v15  ;;  %v2139_v9 = vld [vmem:[#allocation2 + $0xa0] sm:$0x3] }
  0x45   : > { %1600 = vmatpush3.bf16.msra.mxu0 %v1714_v16  ;;  %1633 = vmatpush3.bf16.msra.mxu1 %v1714_v16  ;;  %v1022_v16 = vrot.slane %v974_v34, 1  ;;  %v1146_v19 = vrot.slane %v1098_v10, 2  ;;  %v1147_v20 = vrot.slane %v1099_v13, 2  ;;  %v1149_v21 = vrot.slane %v1100_v14, 2 }
  0x46   : > { %1601 = vmatprep.subr.bf16.mxu0 %v1715_v29  ;;  %1626 = vmatprep.subr.bf16.mxu1 %v1715_v29  ;;  %v1026_v25 = vsel %vm452_vm0, %v1023_v17, %v1025_v18  ;;  %v541_v27 = vmul.f32 %v2000_v50, %v2075_v59  ;;  %v474_v38 = vrot.slane %v417_v23, 1  ;;  %v476_v39 = vrot.slane %v418_v26, 1  ;;  %v2157_v26 = vld [vmem:[#allocation2 + $0x28] sm:$0xff] }
  0x47   : > { %v1024_v24 = vsel %vm452_vm0, %v1022_v16, %v1023_v17  ;;  %v1148_v30 = vsel %vm577_vm1, %v1146_v19, %v1147_v20  ;;  %v1150_v31 = vsel %vm577_vm1, %v1147_v20, %v1149_v21  ;;  %v542_v40 = vmul.f32 %v2000_v50, %v2085_v63  ;;  %v2155_v21 = vld [vmem:[#allocation2 + $0x90] sm:$0xff] }
  0x48   : > { %v1078_v28 = vadd.f32 %v1024_v24, %v954_v11  ;;  %v543_v44 = vmul.f32 %v2000_v50, %v2106_v15  ;;  %v598_v46 = vrot.slane %v541_v27, 2  ;;  %v475_v47 = vsel %vm452_vm0, %v473_v33, %v474_v38 }
  0x49   : > { %1602 = vmatpush3.bf16.msra.mxu0 %v1715_v29  ;;  %1634 = vmatpush3.bf16.msra.mxu1 %v1715_v29  ;;  %v1079_v29 = vadd.f32 %v1026_v25, %v955_v12  ;;  %v477_v54 = vsel %vm452_vm0, %v474_v38, %v476_v39  ;;  %v599_v55 = vrot.slane %v542_v40, 2  ;;  %v662_v56 = vmul.f32 %v2003_v51, %v2127_v43  ;;  %v2167_v40 = vld [vmem:[#allocation2 + $0xe0] sm:$0x3] }
  0x4a   : > { %v1202_v41 = vadd.f32 %v1148_v30, %v1078_v28  ;;  %v517_v34 = vadd.f32 %v475_v47, %v376_v0  ;;  %v518_v36 = vadd.f32 %v477_v54, %v377_v45  ;;  %v601_v11 = vrot.slane %v543_v44, 2 }
  0x4b   : > { %v1203_v42 = vadd.f32 %v1150_v31, %v1079_v29  ;;  %v600_v10 = vsel %vm577_vm1, %v598_v46, %v599_v55  ;;  %v663_v12 = vmul.f32 %v2003_v51, %v2137_v7  ;;  %v702_v13 = vmul.f32 %v2006_v52, %v2127_v43 }
  0x4c   : > { %v1225_v57 = vadd.f32 %v2123_v32, %v1202_v41  ;;  %v642_v16 = vadd.f32 %v600_v10, %v517_v34  ;;  %v703_v17 = vmul.f32 %v2006_v52, %v2137_v7  ;;  %v704_v0 = vmul.f32 %v2006_v52, %v2139_v9 }
  0x4d   : > { %v1226_v5 = vadd.f32 %v2123_v32, %v1203_v42  ;;  %v602_v45 = vsel %vm577_vm1, %v599_v55, %v601_v11  ;;  %v758_v18 = vrot.slane %v702_v13, 1  ;;  %v826_v19 = vmul.f32 %v2009_v53, %v2127_v43 }
  0x4e   : > { %v827_v20 = vmul.f32 %v2009_v53, %v2137_v7  ;;  %v643_v22 = vadd.f32 %v602_v45, %v518_v36  ;;  %v678_v23 = vadd.f32 %v662_v56, %v642_v16  ;;  %v759_v24 = vrot.slane %v703_v17, 1 }
  0x4f   : > { %v1241_v14 = vpack.c.bf16 %v1226_v5, %v1225_v57  ;;  %v761_v25 = vrot.slane %v704_v0, 1  ;;  %v828_v27 = vmul.f32 %v2009_v53, %v2139_v9  ;;  %v882_v28 = vrot.slane %v826_v19, 2 }
  0x50   : > { %v883_v29 = vrot.slane %v827_v20, 2  ;;  %v946_v30 = vmul.f32 %v2015_v58, %v2155_v21  ;;  %v679_v31 = vadd.f32 %v663_v12, %v643_v22  ;;  %v760_v33 = vsel %vm452_vm0, %v758_v18, %v759_v24 }
  0x51   : > { %1603 = vmatprep.mubr.bf16.mxu0 %v1241_v14  ;;  %v762_v38 = vsel %vm452_vm0, %v759_v24, %v761_v25  ;;  %v947_v39 = vmul.f32 %v2015_v58, %v2157_v26  ;;  %v802_v41 = vadd.f32 %v760_v33, %v678_v23  ;;  %v885_v44 = vrot.slane %v828_v27, 2 }
  0x52   : > { %v884_v42 = vsel %vm577_vm1, %v882_v28, %v883_v29  ;;  %v986_v46 = vmul.f32 %v2079_v61, %v2155_v21  ;;  %v803_v47 = vadd.f32 %v762_v38, %v679_v31  ;;  %v987_v54 = vmul.f32 %v2079_v61, %v2157_v26 }
  0x53   : > { %v988_v55 = vmul.f32 %v2079_v61, %v2167_v40  ;;  %v1110_v56 = vmul.f32 %v2083_v62, %v2155_v21  ;;  %v886_v57 = vsel %vm577_vm1, %v883_v29, %v885_v44  ;;  %v926_v5 = vadd.f32 %v884_v42, %v802_v41 }
  0x54   : > { %v1042_v34 = vrot.slane %v986_v46, 1  ;;  %v1111_v36 = vmul.f32 %v2083_v62, %v2157_v26  ;;  %v927_v10 = vadd.f32 %v886_v57, %v803_v47  ;;  %v1043_v11 = vrot.slane %v987_v54, 1 }
  0x55   : > { %v1045_v12 = vrot.slane %v988_v55, 1  ;;  %v1112_v13 = vmul.f32 %v2083_v62, %v2167_v40  ;;  %v962_v14 = vadd.f32 %v946_v30, %v926_v5  ;;  %v1166_v16 = vrot.slane %v1110_v56, 2 }
  0x56   : > { %v1167_v17 = vrot.slane %v1111_v36, 2  ;;  %v370_v0 = vmul.f32 %v1994_v48, %v2025_v3  ;;  %v963_v45 = vadd.f32 %v947_v39, %v927_v10  ;;  %v1044_v18 = vsel %vm452_vm0, %v1042_v34, %v1043_v11 }
  0x57   : > { %v1046_v19 = vsel %vm452_vm0, %v1043_v11, %v1045_v12  ;;  %v1169_v20 = vrot.slane %v1112_v13, 2  ;;  %v1086_v22 = vadd.f32 %v1044_v18, %v962_v14  ;;  %v371_v24 = vmul.f32 %v1994_v48, %v2033_v8 }
  0x58   : > { %v1168_v23 = vsel %vm577_vm1, %v1166_v16, %v1167_v17  ;;  %v407_v25 = vmul.f32 %v1997_v49, %v2025_v3  ;;  %v1087_v27 = vadd.f32 %v1046_v19, %v963_v45  ;;  %v408_v29 = vmul.f32 %v1997_v49, %v2033_v8 }
  0x59   : > { %v1170_v28 = vsel %vm577_vm1, %v1167_v17, %v1169_v20  ;;  %v532_v30 = vmul.f32 %v2000_v50, %v2025_v3  ;;  %v1210_v31 = vadd.f32 %v1168_v23, %v1086_v22  ;;  %v533_v38 = vmul.f32 %v2000_v50, %v2033_v8  ;;  %v2219_v17 = vld [vmem:[#allocation2 + $0x48] sm:$0xff] }
  0x5a   : > { %v458_v33 = vrot.slane %v407_v25, 1  ;;  %v656_v39 = vmul.f32 %v2003_v51, %v2060_v35  ;;  %v1211_v41 = vadd.f32 %v1170_v28, %v1087_v27  ;;  %v459_v42 = vrot.slane %v408_v29, 1  ;;  %v2231_v20 = vld [vmem:[#allocation2 + $0x68] sm:$0xff]  ;;  %v2233_v27 = vld [vmem:[#allocation2 + $0x10] sm:$0x3] }
  0x5b   : > { %v583_v44 = vrot.slane %v532_v30, 2  ;;  %v657_v46 = vmul.f32 %v2003_v51, %v2062_v37  ;;  %v1233_v47 = vadd.f32 %v2123_v32, %v1210_v31  ;;  %v584_v54 = vrot.slane %v533_v38, 2 }
  0x5c   : > { %v693_v3 = vmul.f32 %v2006_v52, %v2060_v35  ;;  %v694_v55 = vmul.f32 %v2006_v52, %v2062_v37  ;;  %v1234_v8 = vadd.f32 %v2123_v32, %v1211_v41  ;;  %v460_v56 = vsel %vm452_vm0, %v458_v33, %v459_v42 }
  0x5d   : > { %v462_v57 = vsel %vm452_vm0, %v459_v42, %v461_v60  ;;  %v695_v5 = vmul.f32 %v2006_v52, %v2089_v1  ;;  %v511_v34 = vadd.f32 %v460_v56, %v370_v0  ;;  %v585_v10 = vsel %vm577_vm1, %v583_v44, %v584_v54 }
  0x5e   : > { %v512_v36 = vadd.f32 %v462_v57, %v371_v24  ;;  %v587_v11 = vsel %vm577_vm1, %v584_v54, %v586_v2  ;;  %v1245_v12 = vpack.c.bf16 %v1234_v8, %v1233_v47  ;;  %v743_v13 = vrot.slane %v693_v3, 1 }
  0x5f   : > { %v744_v14 = vrot.slane %v694_v55, 1  ;;  %v746_v16 = vrot.slane %v695_v5, 1  ;;  %v636_v4 = vadd.f32 %v585_v10, %v511_v34  ;;  %v817_v60 = vmul.f32 %v2009_v53, %v2060_v35 }
  0x60   : > { %v637_v45 = vadd.f32 %v587_v11, %v512_v36  ;;  %v818_v0 = vmul.f32 %v2009_v53, %v2062_v37  ;;  %1611 = vmatprep.mubr.bf16.mxu1 %v1245_v12  ;;  %v819_v2 = vmul.f32 %v2009_v53, %v2089_v1  ;;  %v940_v19 = vmul.f32 %v2015_v58, %v2219_v17 }
  0x61   : > { %v745_v18 = vsel %vm452_vm0, %v743_v13, %v744_v14  ;;  %v747_v6 = vsel %vm452_vm0, %v744_v14, %v746_v16  ;;  %v672_v22 = vadd.f32 %v656_v39, %v636_v4  ;;  %v867_v24 = vrot.slane %v817_v60, 2 }
  0x62   : > { %v673_v23 = vadd.f32 %v657_v46, %v637_v45  ;;  %v868_v25 = vrot.slane %v818_v0, 2  ;;  %v870_v28 = vrot.slane %v819_v2, 2  ;;  %v941_v29 = vmul.f32 %v2015_v58, %v2231_v20 }
  0x63   : > { %v977_v30 = vmul.f32 %v2079_v61, %v2219_v17  ;;  %v978_v31 = vmul.f32 %v2079_v61, %v2231_v20  ;;  %v796_v33 = vadd.f32 %v745_v18, %v672_v22  ;;  %v979_v39 = vmul.f32 %v2079_v61, %v2233_v27 }
  0x64   : > { %v797_v38 = vadd.f32 %v747_v6, %v673_v23  ;;  %v869_v41 = vsel %vm577_vm1, %v867_v24, %v868_v25  ;;  %v871_v42 = vsel %vm577_vm1, %v868_v25, %v870_v28  ;;  %v1101_v47 = vmul.f32 %v2083_v62, %v2219_v17 }
  0x65   : > { %v1027_v44 = vrot.slane %v977_v30, 1  ;;  %v1028_v46 = vrot.slane %v978_v31, 1  ;;  %v920_v54 = vadd.f32 %v869_v41, %v796_v33  ;;  %v1030_v55 = vrot.slane %v979_v39, 1 }
  0x66   : > { %v921_v3 = vadd.f32 %v871_v42, %v797_v38  ;;  %v1102_v8 = vmul.f32 %v2083_v62, %v2231_v20  ;;  %v1103_v57 = vmul.f32 %v2083_v62, %v2233_v27  ;;  %v1151_v5 = vrot.slane %v1101_v47, 2 }
  0x67   : > { %v1029_v56 = vsel %vm452_vm0, %v1027_v44, %v1028_v46  ;;  %v378_v34 = vmul.f32 %v1994_v48, %v2127_v43  ;;  %v956_v36 = vadd.f32 %v940_v19, %v920_v54  ;;  %v1031_v11 = vsel %vm452_vm0, %v1028_v46, %v1030_v55 }
  0x68   : > { %v957_v10 = vadd.f32 %v941_v29, %v921_v3  ;;  %v1152_v12 = vrot.slane %v1102_v8, 2  ;;  %v1154_v13 = vrot.slane %v1103_v57, 2  ;;  %v379_v14 = vmul.f32 %v1994_v48, %v2137_v7 }
  0x69   : > { %v419_v16 = vmul.f32 %v1997_v49, %v2127_v43  ;;  %v420_v4 = vmul.f32 %v1997_v49, %v2137_v7  ;;  %v1080_v45 = vadd.f32 %v1029_v56, %v956_v36  ;;  %v421_v18 = vmul.f32 %v1997_v49, %v2139_v9 }
  0x6a   : > { %v1081_v60 = vadd.f32 %v1031_v11, %v957_v10  ;;  %v1153_v0 = vsel %vm577_vm1, %v1151_v5, %v1152_v12  ;;  %v1155_v6 = vsel %vm577_vm1, %v1152_v12, %v1154_v13  ;;  %v544_v22 = vmul.f32 %v2000_v50, %v2127_v43 }
  0x6b   : > { %v478_v2 = vrot.slane %v419_v16, 1  ;;  %v479_v19 = vrot.slane %v420_v4, 1  ;;  %v1204_v23 = vadd.f32 %v1153_v0, %v1080_v45  ;;  %v481_v25 = vrot.slane %v421_v18, 1  ;;  %v2295_v0 = vld [vmem:[#allocation2 + $0x60] sm:$0xff] }
  0x6c   : > { %v1205_v24 = vadd.f32 %v1155_v6, %v1081_v60  ;;  %v545_v28 = vmul.f32 %v2000_v50, %v2137_v7  ;;  %v546_v30 = vmul.f32 %v2000_v50, %v2139_v9  ;;  %v603_v31 = vrot.slane %v544_v22, 2 }
  0x6d   : > { %v480_v29 = vsel %vm452_vm0, %v478_v2, %v479_v19  ;;  %v664_v33 = vmul.f32 %v2003_v51, %v2155_v21  ;;  %v1227_v38 = vadd.f32 %v2123_v32, %v1204_v23  ;;  %v482_v39 = vsel %vm452_vm0, %v479_v19, %v481_v25 }
  0x6e   : > { %v1228_v41 = vadd.f32 %v2123_v32, %v1205_v24  ;;  %v519_v42 = vadd.f32 %v480_v29, %v378_v34  ;;  %v520_v44 = vadd.f32 %v482_v39, %v379_v14  ;;  %v604_v46 = vrot.slane %v545_v28, 2  ;;  %v2291_v14 = vld [vmem:[#allocation2 + $0xa8] sm:$0xff] }
  0x6f   : > { %v606_v47 = vrot.slane %v546_v30, 2  ;;  %v665_v54 = vmul.f32 %v2003_v51, %v2157_v26  ;;  %v705_v55 = vmul.f32 %v2006_v52, %v2155_v21  ;;  %v706_v8 = vmul.f32 %v2006_v52, %v2157_v26  ;;  %v2304_v28 = vld [vmem:[#allocation2 + $0x88] sm:$0x3] }
  0x70   : > { %v1242_v3 = vpack.c.bf16 %v1228_v41, %v1227_v38  ;;  %v707_v56 = vmul.f32 %v2006_v52, %v2167_v40  ;;  %v605_v57 = vsel %vm577_vm1, %v603_v31, %v604_v46  ;;  %v829_v34 = vmul.f32 %v2009_v53, %v2155_v21 }
  0x71   : > { %v607_v5 = vsel %vm577_vm1, %v604_v46, %v606_v47  ;;  %v830_v36 = vmul.f32 %v2009_v53, %v2157_v26  ;;  %v644_v10 = vadd.f32 %v605_v57, %v519_v42  ;;  %v763_v12 = vrot.slane %v705_v55, 1 }
  0x72   : > { %1604 = vmatmul.mubr.bf16.vlgmr.msra.gmra.mxu0 %v1242_v3  ;;  %v645_v11 = vadd.f32 %v607_v5, %v520_v44  ;;  %v764_v13 = vrot.slane %v706_v8, 1  ;;  %v766_v16 = vrot.slane %v707_v56, 1  ;;  %v831_v4 = vmul.f32 %v2009_v53, %v2167_v40 }
  0x73   : > { %v887_v45 = vrot.slane %v829_v34, 2  ;;  %v888_v60 = vrot.slane %v830_v36, 2  ;;  %v680_v18 = vadd.f32 %v664_v33, %v644_v10  ;;  %v948_v19 = vmul.f32 %v2015_v58, %v2291_v14 }
  0x74   : > { %v681_v6 = vadd.f32 %v665_v54, %v645_v11  ;;  %v765_v2 = vsel %vm452_vm0, %v763_v12, %v764_v13  ;;  %v767_v22 = vsel %vm452_vm0, %v764_v13, %v766_v16  ;;  %v890_v24 = vrot.slane %v831_v4, 2 }
  0x75   : > { %v889_v23 = vsel %vm577_vm1, %v887_v45, %v888_v60  ;;  %v949_v25 = vmul.f32 %v2015_v58, %v2295_v0  ;;  %v804_v29 = vadd.f32 %v765_v2, %v680_v18  ;;  %v989_v31 = vmul.f32 %v2079_v61, %v2291_v14 }
  0x76   : > { %v805_v30 = vadd.f32 %v767_v22, %v681_v6  ;;  %v990_v33 = vmul.f32 %v2079_v61, %v2295_v0  ;;  %v891_v38 = vsel %vm577_vm1, %v888_v60, %v890_v24  ;;  %v991_v41 = vmul.f32 %v2079_v61, %v2304_v28 }
  0x77   : > { %v1113_v39 = vmul.f32 %v2083_v62, %v2291_v14  ;;  %v1114_v42 = vmul.f32 %v2083_v62, %v2295_v0  ;;  %v928_v44 = vadd.f32 %v889_v23, %v804_v29  ;;  %v1047_v47 = vrot.slane %v989_v31, 1 }
  0x78   : > { %v929_v46 = vadd.f32 %v891_v38, %v805_v30  ;;  %v1048_v54 = vrot.slane %v990_v33, 1  ;;  %v1050_v3 = vrot.slane %v991_v41, 1  ;;  %v1115_v55 = vmul.f32 %v2083_v62, %v2304_v28 }
  0x79   : > { %v1171_v8 = vrot.slane %v1113_v39, 2  ;;  %v1172_v56 = vrot.slane %v1114_v42, 2  ;;  %v964_v57 = vadd.f32 %v948_v19, %v928_v44  ;;  %v372_v36 = vmul.f32 %v1994_v48, %v2060_v35 }
  0x7a   : > { %v965_v5 = vadd.f32 %v949_v25, %v929_v46  ;;  %v1049_v34 = vsel %vm452_vm0, %v1047_v47, %v1048_v54  ;;  %v1051_v10 = vsel %vm452_vm0, %v1048_v54, %v1050_v3  ;;  %v1174_v12 = vrot.slane %v1115_v55, 2 }
  0x7b   : > { %v1173_v11 = vsel %vm577_vm1, %v1171_v8, %v1172_v56  ;;  %v373_v13 = vmul.f32 %v1994_v48, %v2062_v37  ;;  %v1088_v16 = vadd.f32 %v1049_v34, %v964_v57  ;;  %v410_v45 = vmul.f32 %v1997_v49, %v2060_v35 }
  0x7c   : > { %v1089_v4 = vadd.f32 %v1051_v10, %v965_v5  ;;  %v411_v60 = vmul.f32 %v1997_v49, %v2062_v37  ;;  %v1175_v18 = vsel %vm577_vm1, %v1172_v56, %v1174_v12  ;;  %v412_v6 = vmul.f32 %v1997_v49, %v2089_v1 }
  0x7d   : > { %v535_v2 = vmul.f32 %v2000_v50, %v2060_v35  ;;  %v536_v19 = vmul.f32 %v2000_v50, %v2062_v37  ;;  %v1212_v22 = vadd.f32 %v1173_v11, %v1088_v16  ;;  %v463_v24 = vrot.slane %v410_v45, 1 }
  0x7e   : > { %v1213_v23 = vadd.f32 %v1175_v18, %v1089_v4  ;;  %v464_v25 = vrot.slane %v411_v60, 1  ;;  %v466_v29 = vrot.slane %v412_v6, 1  ;;  %v537_v30 = vmul.f32 %v2000_v50, %v2089_v1 }
  0x7f   : > { %v588_v31 = vrot.slane %v535_v2, 2  ;;  %v589_v33 = vrot.slane %v536_v19, 2  ;;  %v1235_v38 = vadd.f32 %v2123_v32, %v1212_v22  ;;  %v658_v35 = vmul.f32 %v2003_v51, %v2219_v17 }
  0x80   : > { %v1236_v41 = vadd.f32 %v2123_v32, %v1213_v23  ;;  %v465_v39 = vsel %vm452_vm0, %v463_v24, %v464_v25  ;;  %v467_v37 = vsel %vm452_vm0, %v464_v25, %v466_v29  ;;  %v591_v46 = vrot.slane %v537_v30, 2 }
  0x81   : > { %v513_v42 = vadd.f32 %v465_v39, %v372_v36  ;;  %v590_v44 = vsel %vm577_vm1, %v588_v31, %v589_v33  ;;  %v514_v54 = vadd.f32 %v467_v37, %v373_v13  ;;  %v659_v1 = vmul.f32 %v2003_v51, %v2231_v20 }
  0x82   : > { %v1246_v47 = vpack.c.bf16 %v1236_v41, %v1235_v38  ;;  %v696_v3 = vmul.f32 %v2006_v52, %v2219_v17  ;;  %v592_v55 = vsel %vm577_vm1, %v589_v33, %v591_v46  ;;  %v697_v56 = vmul.f32 %v2006_v52, %v2231_v20 }
  0x83   : > { %v638_v8 = vadd.f32 %v590_v44, %v513_v42  ;;  %v698_v57 = vmul.f32 %v2006_v52, %v2233_v27  ;;  %v639_v5 = vadd.f32 %v592_v55, %v514_v54  ;;  %v820_v36 = vmul.f32 %v2009_v53, %v2219_v17 }
  0x84   : > { %1612 = vmatmul.mubr.bf16.vlgmr.msra.gmra.mxu1 %v1246_v47  ;;  %v748_v34 = vrot.slane %v696_v3, 1  ;;  %v821_v10 = vmul.f32 %v2009_v53, %v2231_v20  ;;  %v749_v12 = vrot.slane %v697_v56, 1  ;;  %v822_v16 = vmul.f32 %v2009_v53, %v2233_v27 }
  0x85   : > { %v674_v11 = vadd.f32 %v658_v35, %v638_v8  ;;  %v751_v13 = vrot.slane %v698_v57, 1  ;;  %v675_v4 = vadd.f32 %v659_v1, %v639_v5  ;;  %v872_v45 = vrot.slane %v820_v36, 2 }
  0x86   : > { %v873_v60 = vrot.slane %v821_v10, 2  ;;  %v942_v18 = vmul.f32 %v2015_v58, %v2075_v59  ;;  %v750_v6 = vsel %vm452_vm0, %v748_v34, %v749_v12  ;;  %v875_v19 = vrot.slane %v822_v16, 2 }
  0x87   : > { %v752_v2 = vsel %vm452_vm0, %v749_v12, %v751_v13  ;;  %v943_v22 = vmul.f32 %v2015_v58, %v2085_v63  ;;  %v798_v23 = vadd.f32 %v750_v6, %v674_v11  ;;  %v980_v29 = vmul.f32 %v2079_v61, %v2075_v59 }
  0x88   : > { %v799_v24 = vadd.f32 %v752_v2, %v675_v4  ;;  %v874_v25 = vsel %vm577_vm1, %v872_v45, %v873_v60  ;;  %v876_v30 = vsel %vm577_vm1, %v873_v60, %v875_v19  ;;  %v981_v31 = vmul.f32 %v2079_v61, %v2085_v63 }
  0x89   : > { %v982_v33 = vmul.f32 %v2079_v61, %v2106_v15  ;;  %v1104_v38 = vmul.f32 %v2083_v62, %v2075_v59  ;;  %v922_v41 = vadd.f32 %v874_v25, %v798_v23  ;;  %v1032_v35 = vrot.slane %v980_v29, 1 }
  0x8a   : > { %v923_v39 = vadd.f32 %v876_v30, %v799_v24  ;;  %v1105_v37 = vmul.f32 %v2083_v62, %v2085_v63  ;;  %v1033_v42 = vrot.slane %v981_v31, 1  ;;  %v1106_v46 = vmul.f32 %v2083_v62, %v2106_v15 }
  0x8b   : > { %v1035_v44 = vrot.slane %v982_v33, 1  ;;  %v1156_v47 = vrot.slane %v1104_v38, 2  ;;  %v958_v54 = vadd.f32 %v942_v18, %v922_v41  ;;  %v380_v55 = vmul.f32 %v1994_v48, %v2155_v21 }
  0x8c   : > { %v959_v1 = vadd.f32 %v943_v22, %v923_v39  ;;  %v1157_v3 = vrot.slane %v1105_v37, 2  ;;  %v1034_v8 = vsel %vm452_vm0, %v1032_v35, %v1033_v42  ;;  %v1159_v57 = vrot.slane %v1106_v46, 2 }
  0x8d   : > { %v1036_v56 = vsel %vm452_vm0, %v1033_v42, %v1035_v44  ;;  %v381_v5 = vmul.f32 %v1994_v48, %v2157_v26  ;;  %v1082_v34 = vadd.f32 %v1034_v8, %v958_v54  ;;  %v422_v11 = vmul.f32 %v1997_v49, %v2155_v21 }
  0x8e   : > { %v1083_v36 = vadd.f32 %v1036_v56, %v959_v1  ;;  %v1158_v10 = vsel %vm577_vm1, %v1156_v47, %v1157_v3  ;;  %v1160_v12 = vsel %vm577_vm1, %v1157_v3, %v1159_v57  ;;  %v423_v13 = vmul.f32 %v1997_v49, %v2157_v26  ;;  %v2423_v57 = vld [vmem:[#allocation2 + $0x8] sm:$0xff] }
  0x8f   : > { %v424_v16 = vmul.f32 %v1997_v49, %v2167_v40  ;;  %v547_v4 = vmul.f32 %v2000_v50, %v2155_v21  ;;  %v1206_v45 = vadd.f32 %v1158_v10, %v1082_v34  ;;  %v483_v18 = vrot.slane %v422_v11, 1  ;;  %v2425_v11 = vld [vmem:[#allocation2 + $0xb0] sm:$0xff] }
  0x90   : > { %v1207_v60 = vadd.f32 %v1160_v12, %v1083_v36  ;;  %v548_v6 = vmul.f32 %v2000_v50, %v2157_v26  ;;  %v484_v2 = vrot.slane %v423_v13, 1  ;;  %v549_v22 = vmul.f32 %v2000_v50, %v2167_v40 }
  0x91   : > { %v486_v19 = vrot.slane %v424_v16, 1  ;;  %v608_v23 = vrot.slane %v547_v4, 2  ;;  %v1229_v24 = vadd.f32 %v2123_v32, %v1206_v45  ;;  %v666_v21 = vmul.f32 %v2003_v51, %v2291_v14  ;;  %v2431_v45 = vld [vmem:[#allocation2 + $0xd0] sm:$0x3] }
  0x92   : > { %v1230_v25 = vadd.f32 %v2123_v32, %v1207_v60  ;;  %v609_v29 = vrot.slane %v548_v6, 2  ;;  %v485_v30 = vsel %vm452_vm0, %v483_v18, %v484_v2  ;;  %v611_v33 = vrot.slane %v549_v22, 2 }
  0x93   : > { %v487_v31 = vsel %vm452_vm0, %v484_v2, %v486_v19  ;;  %v667_v26 = vmul.f32 %v2003_v51, %v2295_v0  ;;  %v521_v41 = vadd.f32 %v485_v30, %v380_v55  ;;  %v708_v37 = vmul.f32 %v2006_v52, %v2291_v14 }
  0x94   : > { %v1243_v38 = vpack.c.bf16 %v1230_v25, %v1229_v24  ;;  %v522_v40 = vadd.f32 %v487_v31, %v381_v5  ;;  %v610_v39 = vsel %vm577_vm1, %v608_v23, %v609_v29  ;;  %v612_v35 = vsel %vm577_vm1, %v609_v29, %v611_v33 }
  0x95   : > { %v709_v42 = vmul.f32 %v2006_v52, %v2295_v0  ;;  %v710_v44 = vmul.f32 %v2006_v52, %v2304_v28  ;;  %v646_v46 = vadd.f32 %v610_v39, %v521_v41  ;;  %v832_v54 = vmul.f32 %v2009_v53, %v2291_v14 }
  0x96   : > { %1607 = vmatprep.mubr.bf16.mxu0 %v1243_v38  ;;  %v647_v47 = vadd.f32 %v612_v35, %v522_v40  ;;  %v833_v1 = vmul.f32 %v2009_v53, %v2295_v0  ;;  %v768_v3 = vrot.slane %v708_v37, 1  ;;  %v834_v56 = vmul.f32 %v2009_v53, %v2304_v28 }
  0x97   : > { %v769_v55 = vrot.slane %v709_v42, 1  ;;  %v771_v8 = vrot.slane %v710_v44, 1  ;;  %v682_v5 = vadd.f32 %v666_v21, %v646_v46  ;;  %v892_v36 = vrot.slane %v832_v54, 2 }
  0x98   : > { %v683_v34 = vadd.f32 %v667_v26, %v647_v47  ;;  %v893_v10 = vrot.slane %v833_v1, 2  ;;  %v895_v16 = vrot.slane %v834_v56, 2  ;;  %v950_v4 = vmul.f32 %v2015_v58, %v2423_v57 }
  0x99   : > { %v770_v12 = vsel %vm452_vm0, %v768_v3, %v769_v55  ;;  %v772_v13 = vsel %vm452_vm0, %v769_v55, %v771_v8  ;;  %v951_v2 = vmul.f32 %v2015_v58, %v2425_v11  ;;  %v992_v22 = vmul.f32 %v2079_v61, %v2423_v57 }
  0x9a   : > { %v806_v60 = vadd.f32 %v770_v12, %v682_v5  ;;  %v807_v18 = vadd.f32 %v772_v13, %v683_v34  ;;  %v894_v6 = vsel %vm577_vm1, %v892_v36, %v893_v10  ;;  %v896_v19 = vsel %vm577_vm1, %v893_v10, %v895_v16 }
  0x9b   : > { %v993_v23 = vmul.f32 %v2079_v61, %v2425_v11  ;;  %v994_v24 = vmul.f32 %v2079_v61, %v2431_v45  ;;  %v1116_v21 = vmul.f32 %v2083_v62, %v2423_v57  ;;  %v1117_v30 = vmul.f32 %v2083_v62, %v2425_v11 }
  0x9c   : > { %v930_v25 = vadd.f32 %v894_v6, %v806_v60  ;;  %v931_v29 = vadd.f32 %v896_v19, %v807_v18  ;;  %v1052_v31 = vrot.slane %v992_v22, 1  ;;  %v1118_v38 = vmul.f32 %v2083_v62, %v2431_v45 }
  0x9d   : > { %v1053_v33 = vrot.slane %v993_v23, 1  ;;  %v1055_v26 = vrot.slane %v994_v24, 1  ;;  %v1176_v39 = vrot.slane %v1116_v21, 2  ;;  %v1177_v35 = vrot.slane %v1117_v30, 2 }
  0x9e   : > { %v966_v41 = vadd.f32 %v950_v4, %v930_v25  ;;  %v967_v40 = vadd.f32 %v951_v2, %v931_v29  ;;  %v1179_v44 = vrot.slane %v1118_v38, 2  ;;  %v374_v46 = vmul.f32 %v1994_v48, %v2219_v17 }
  0x9f   : > { %v1054_v37 = vsel %vm452_vm0, %v1052_v31, %v1053_v33  ;;  %v1056_v42 = vsel %vm452_vm0, %v1053_v33, %v1055_v26  ;;  %v1178_v1 = vsel %vm577_vm1, %v1176_v39, %v1177_v35  ;;  %v375_v3 = vmul.f32 %v1994_v48, %v2231_v20 }
  0xa0   : > { %v1090_v47 = vadd.f32 %v1054_v37, %v966_v41  ;;  %v1091_v54 = vadd.f32 %v1056_v42, %v967_v40  ;;  %v1180_v55 = vsel %vm577_vm1, %v1177_v35, %v1179_v44  ;;  %v413_v8 = vmul.f32 %v1997_v49, %v2219_v17 }
  0xa1   : > { %v414_v56 = vmul.f32 %v1997_v49, %v2231_v20  ;;  %v415_v5 = vmul.f32 %v1997_v49, %v2233_v27  ;;  %v538_v10 = vmul.f32 %v2000_v50, %v2219_v17  ;;  %v539_v12 = vmul.f32 %v2000_v50, %v2231_v20 }
  0xa2   : > { %v1214_v34 = vadd.f32 %v1178_v1, %v1090_v47  ;;  %v1215_v36 = vadd.f32 %v1180_v55, %v1091_v54  ;;  %v468_v13 = vrot.slane %v413_v8, 1  ;;  %v540_v60 = vmul.f32 %v2000_v50, %v2233_v27 }
  0xa3   : > { %v469_v16 = vrot.slane %v414_v56, 1  ;;  %v471_v4 = vrot.slane %v415_v5, 1  ;;  %v593_v2 = vrot.slane %v538_v10, 2  ;;  %v594_v19 = vrot.slane %v539_v12, 2 }
  0xa4   : > { %v1237_v18 = vadd.f32 %v2123_v32, %v1214_v34  ;;  %v1238_v6 = vadd.f32 %v2123_v32, %v1215_v36  ;;  %v596_v17 = vrot.slane %v540_v60, 2  ;;  %v660_v20 = vmul.f32 %v2003_v51, %v2075_v59 }
  0xa5   : > { %v470_v22 = vsel %vm452_vm0, %v468_v13, %v469_v16  ;;  %v472_v23 = vsel %vm452_vm0, %v469_v16, %v471_v4  ;;  %v595_v21 = vsel %vm577_vm1, %v593_v2, %v594_v19  ;;  %v661_v30 = vmul.f32 %v2003_v51, %v2085_v63 }
  0xa6   : > { %v1247_v24 = vpack.c.bf16 %v1238_v6, %v1237_v18  ;;  %v515_v25 = vadd.f32 %v470_v22, %v374_v46  ;;  %v516_v29 = vadd.f32 %v472_v23, %v375_v3  ;;  %v597_v27 = vsel %vm577_vm1, %v594_v19, %v596_v17 }
  0xa7   : > { %v699_v31 = vmul.f32 %v2006_v52, %v2075_v59  ;;  %v700_v33 = vmul.f32 %v2006_v52, %v2085_v63  ;;  %v701_v41 = vmul.f32 %v2006_v52, %v2106_v15  ;;  %v823_v40 = vmul.f32 %v2009_v53, %v2075_v59 }
  0xa8   : > { %1615 = vmatprep.mubr.bf16.mxu1 %v1247_v24  ;;  %v640_v26 = vadd.f32 %v595_v21, %v515_v25  ;;  %v641_v38 = vadd.f32 %v597_v27, %v516_v29  ;;  %v824_v37 = vmul.f32 %v2009_v53, %v2085_v63  ;;  %v825_v42 = vmul.f32 %v2009_v53, %v2106_v15 }
  0xa9   : > { %v753_v39 = vrot.slane %v699_v31, 1  ;;  %v754_v35 = vrot.slane %v700_v33, 1  ;;  %v756_v47 = vrot.slane %v701_v41, 1  ;;  %v877_v54 = vrot.slane %v823_v40, 2 }
  0xaa   : > { %v676_v44 = vadd.f32 %v660_v20, %v640_v26  ;;  %v677_v46 = vadd.f32 %v661_v30, %v641_v38  ;;  %v878_v3 = vrot.slane %v824_v37, 2  ;;  %v880_v55 = vrot.slane %v825_v42, 2 }
  0xab   : > { %v755_v1 = vsel %vm452_vm0, %v753_v39, %v754_v35  ;;  %v944_v8 = vmul.f32 %v2015_v58, %v2127_v43  ;;  %v757_v59 = vsel %vm452_vm0, %v754_v35, %v756_v47  ;;  %v945_v63 = vmul.f32 %v2015_v58, %v2137_v7 }
  0xac   : > { %v800_v56 = vadd.f32 %v755_v1, %v676_v44  ;;  %v983_v15 = vmul.f32 %v2079_v61, %v2127_v43  ;;  %v801_v5 = vadd.f32 %v757_v59, %v677_v46  ;;  %v879_v34 = vsel %vm577_vm1, %v877_v54, %v878_v3 }
  0xad   : > { %v881_v36 = vsel %vm577_vm1, %v878_v3, %v880_v55  ;;  %v984_v10 = vmul.f32 %v2079_v61, %v2137_v7  ;;  %v985_v13 = vmul.f32 %v2079_v61, %v2139_v9  ;;  %v1107_v4 = vmul.f32 %v2083_v62, %v2127_v43 }
  0xae   : > { %v924_v12 = vadd.f32 %v879_v34, %v800_v56  ;;  %v1037_v16 = vrot.slane %v983_v15, 1  ;;  %v925_v60 = vadd.f32 %v881_v36, %v801_v5  ;;  %v1108_v6 = vmul.f32 %v2083_v62, %v2137_v7 }
  0xaf   : > { %v1038_v18 = vrot.slane %v984_v10, 1  ;;  %v1109_v2 = vmul.f32 %v2083_v62, %v2139_v9  ;;  %v1040_v22 = vrot.slane %v985_v13, 1  ;;  %v1161_v23 = vrot.slane %v1107_v4, 2 }
  0xb0   : > { %v960_v19 = vadd.f32 %v944_v8, %v924_v12  ;;  %v382_v17 = vmul.f32 %v1994_v48, %v2291_v14  ;;  %v961_v20 = vadd.f32 %v945_v63, %v925_v60  ;;  %v1162_v25 = vrot.slane %v1108_v6, 2  ;;  %v359_v8 = vld [vmem:[#allocation2 + $0x70] sm:$0xff] }
  0xb1   : > { %v1039_v24 = vsel %vm452_vm0, %v1037_v16, %v1038_v18  ;;  %v1164_v29 = vrot.slane %v1109_v2, 2  ;;  %v1041_v43 = vsel %vm452_vm0, %v1038_v18, %v1040_v22  ;;  %v383_v7 = vmul.f32 %v1994_v48, %v2295_v0  ;;  %v361_v6 = vld [vmem:[#allocation2 + $0x30] sm:$0x3] }
  0xb2   : > { %v1084_v21 = vadd.f32 %v1039_v24, %v960_v19  ;;  %v425_v9 = vmul.f32 %v1997_v49, %v2291_v14  ;;  %v1085_v27 = vadd.f32 %v1041_v43, %v961_v20  ;;  %v1163_v30 = vsel %vm577_vm1, %v1161_v23, %v1162_v25 }
  0xb3   : > { %v1165_v31 = vsel %vm577_vm1, %v1162_v25, %v1164_v29  ;;  %v426_v33 = vmul.f32 %v1997_v49, %v2295_v0  ;;  %v427_v38 = vmul.f32 %v1997_v49, %v2304_v28  ;;  %v550_v40 = vmul.f32 %v2000_v50, %v2291_v14 }
  0xb4   : > { %v1208_v26 = vadd.f32 %v1163_v30, %v1084_v21  ;;  %v488_v41 = vrot.slane %v425_v9, 1  ;;  %v1209_v48 = vadd.f32 %v1165_v31, %v1085_v27  ;;  %v551_v35 = vmul.f32 %v2000_v50, %v2295_v0 }
  0xb5   : > { %v489_v39 = vrot.slane %v426_v33, 1  ;;  %v552_v37 = vmul.f32 %v2000_v50, %v2304_v28  ;;  %v491_v44 = vrot.slane %v427_v38, 1  ;;  %v613_v46 = vrot.slane %v550_v40, 2 }
  0xb6   : > { %v1231_v42 = vadd.f32 %v2123_v32, %v1208_v26  ;;  %v668_v47 = vmul.f32 %v2003_v51, %v2423_v57  ;;  %v1232_v49 = vadd.f32 %v2123_v32, %v1209_v48  ;;  %v614_v14 = vrot.slane %v551_v35, 2 }
  0xb7   : > { %v490_v54 = vsel %vm452_vm0, %v488_v41, %v489_v39  ;;  %v616_v1 = vrot.slane %v552_v37, 2  ;;  %v492_v3 = vsel %vm452_vm0, %v489_v39, %v491_v44  ;;  %v669_v0 = vmul.f32 %v2003_v51, %v2425_v11  ;;  %v360_v51 = vld [vmem:[#allocation2 + $0x18] sm:$0xff] }
  0xb8   : > { %v523_v55 = vadd.f32 %v490_v54, %v382_v17  ;;  %v711_v50 = vmul.f32 %v2006_v52, %v2423_v57  ;;  %v1244_v28 = vpack.c.bf16 %v1232_v49, %v1231_v42  ;;  %v524_v59 = vadd.f32 %v492_v3, %v383_v7 }
  0xb9   : > { %v615_v56 = vsel %vm577_vm1, %v613_v46, %v614_v14  ;;  %v617_v32 = vsel %vm577_vm1, %v614_v14, %v616_v1  ;;  %v712_v15 = vmul.f32 %v2006_v52, %v2425_v11  ;;  %v713_v5 = vmul.f32 %v2006_v52, %v2431_v45  ;;  %v1716_v46 = vld [vmem:[%s2656_s2] ss:$0 sm:$0xff] }
  0xba   : > { %v648_v63 = vadd.f32 %v615_v56, %v523_v55  ;;  %v773_v34 = vrot.slane %v711_v50, 1  ;;  %1608 = vmatmul.mubr.bf16.gmra.mxu0 %v1244_v28  ;;  %v649_v36 = vadd.f32 %v617_v32, %v524_v59  ;;  %v835_v10 = vmul.f32 %v2009_v53, %v2423_v57  ;;  %v1555_v14 = vld [vmem:[%s2658_s4] ss:$0 sm:$0xff] }
  0xbb   : > { %v836_v12 = vmul.f32 %v2009_v53, %v2425_v11  ;;  %v837_v13 = vmul.f32 %v2009_v53, %v2431_v45  ;;  %v774_v4 = vrot.slane %v712_v15, 1  ;;  %v776_v60 = vrot.slane %v713_v5, 1 }
  0xbc   : > { %v684_v16 = vadd.f32 %v668_v47, %v648_v63  ;;  %v952_v18 = vmul.f32 %v2015_v58, %v359_v8  ;;  %v685_v52 = vadd.f32 %v669_v0, %v649_v36  ;;  %v897_v2 = vrot.slane %v835_v10, 2 }
  0xbd   : > { %v898_v19 = vrot.slane %v836_v12, 2  ;;  %v900_v22 = vrot.slane %v837_v13, 2  ;;  %v775_v23 = vsel %vm452_vm0, %v773_v34, %v774_v4  ;;  %v777_v57 = vsel %vm452_vm0, %v774_v4, %v776_v60 }
  0xbe   : > { %v953_v17 = vmul.f32 %v2015_v58, %v360_v51  ;;  %v995_v11 = vmul.f32 %v2079_v61, %v359_v8  ;;  %v808_v20 = vadd.f32 %v775_v23, %v684_v16  ;;  %v809_v53 = vadd.f32 %v777_v57, %v685_v52 }
  0xbf   : > { %v899_v45 = vsel %vm577_vm1, %v897_v2, %v898_v19  ;;  %v901_v24 = vsel %vm577_vm1, %v898_v19, %v900_v22  ;;  %v996_v25 = vmul.f32 %v2079_v61, %v360_v51  ;;  %v997_v29 = vmul.f32 %v2079_v61, %v361_v6 }
  0xc0   : > { %v1057_v43 = vrot.slane %v995_v11, 1  ;;  %v1119_v21 = vmul.f32 %v2083_v62, %v359_v8  ;;  %v932_v7 = vadd.f32 %v899_v45, %v808_v20  ;;  %v933_v9 = vadd.f32 %v901_v24, %v809_v53 }
  0xc1   : > { %v1120_v27 = vmul.f32 %v2083_v62, %v360_v51  ;;  %v1121_v58 = vmul.f32 %v2083_v62, %v361_v6  ;;  %v1058_v30 = vrot.slane %v996_v25, 1  ;;  %v1060_v31 = vrot.slane %v997_v29, 1 }
  0xc2   : > { %v1181_v33 = vrot.slane %v1119_v21, 2  ;;  %v968_v26 = vadd.f32 %v952_v18, %v932_v7  ;;  %v969_v38 = vadd.f32 %v953_v17, %v933_v9 }
  0xc3   : > { %v1182_v41 = vrot.slane %v1120_v27, 2  ;;  %v1184_v40 = vrot.slane %v1121_v58, 2  ;;  %v1059_v48 = vsel %vm452_vm0, %v1057_v43, %v1058_v30  ;;  %v1061_v61 = vsel %vm452_vm0, %v1058_v30, %v1060_v31 }
  0xc4   : > { %v1092_v39 = vadd.f32 %v1059_v48, %v968_v26  ;;  %v1093_v35 = vadd.f32 %v1061_v61, %v969_v38 }
  0xc5   : > { %v1183_v37 = vsel %vm577_vm1, %v1181_v33, %v1182_v41  ;;  %v1185_v42 = vsel %vm577_vm1, %v1182_v41, %v1184_v40 }
  0xc6   : > { %v1216_v62 = vadd.f32 %v1183_v37, %v1092_v39  ;;  %v1217_v44 = vadd.f32 %v1185_v42, %v1093_v35 }
  0xc8   : > { %v1239_v47 = vadd.f32 %v1716_v46, %v1216_v62  ;;  %v1240_v49 = vadd.f32 %v1716_v46, %v1217_v44 }
  0xca   : > { %v1248_v54 = vpack.c.bf16 %v1240_v49, %v1239_v47 }
  0xcc   : > { %1616 = vmatmul.mubr.bf16.gmra.mxu1 %v1248_v54 }
 0x132   : > { %v1605_v1 = vpop.f32.mrf.mxu0 }
 0x133   : > { %v1363_v3 = vadd.f32 %v1605_v1, %v1555_v14 }
 0x134   : > { %v1354_v55 = vpop.f32.mrf.mxu0 }
 0x135   : > { %1419 = vst [vmem:[%s1960_s30 + $0x10] sm:$0xff] %v1363_v3  ;;  %v1355_v0 = vadd.f32 %v1555_v14, %v1354_v55 }
 0x136   : > { %v1606_v50 = vpop.f32.mrf.mxu0 }
 0x137   : > { %1417 = vst [vmem:[%s1960_s30] sm:$0xff] %v1355_v0  ;;  %v1366_v28 = vadd.f32 %v1606_v50, %v1555_v14 }
 0x138   : > { %v1357_v8 = vpop.f32.mrf.mxu0 }
 0x139   : > { %1420 = vst [vmem:[%s1960_s30 + $0x18] sm:$0xff] %v1366_v28  ;;  %v1358_v59 = vadd.f32 %v1555_v14, %v1357_v8 }
 0x13b   : > { %1418 = vst [vmem:[%s1960_s30 + $0x8] sm:$0xff] %v1358_v59 }
 0x144   : > { %v1613_v56 = vpop.f32.mrf.mxu1 }
 0x145   : > { %v1395_v32 = vadd.f32 %v1613_v56, %v1555_v14 }
 0x146   : > { %v1386_v63 = vpop.f32.mrf.mxu1 }
 0x147   : > { %1427 = vst [vmem:[%s1960_s30 + $0x50] sm:$0xff] %v1395_v32  ;;  %v1387_v15 = vadd.f32 %v1555_v14, %v1386_v63 }
 0x148   : > { %v1614_v5 = vpop.f32.mrf.mxu1 }
 0x149   : > { %1425 = vst [vmem:[%s1960_s30 + $0x40] sm:$0xff] %v1387_v15  ;;  %v1398_v34 = vadd.f32 %v1614_v5, %v1555_v14 }
 0x14a   : > { %v1389_v51 = vpop.f32.mrf.mxu1 }
 0x14b   : > { %1428 = vst [vmem:[%s1960_s30 + $0x58] sm:$0xff] %v1398_v34  ;;  %v1390_v36 = vadd.f32 %v1555_v14, %v1389_v51 }
 0x14d   : > { %1426 = vst [vmem:[%s1960_s30 + $0x48] sm:$0xff] %v1390_v36 }
 0x17a   : > { %v1609_v10 = vpop.f32.mrf.mxu0 }
 0x17b   : > { %v1379_v12 = vadd.f32 %v1609_v10, %v1555_v14 }
 0x17c   : > { %v1370_v13 = vpop.f32.mrf.mxu0 }
 0x17d   : > { %1423 = vst [vmem:[%s1960_s30 + $0x30] sm:$0xff] %v1379_v12  ;;  %v1371_v16 = vadd.f32 %v1555_v14, %v1370_v13 }
 0x17e   : > { %v1610_v4 = vpop.f32.mrf.mxu0 }
 0x17f   : > { %1421 = vst [vmem:[%s1960_s30 + $0x20] sm:$0xff] %v1371_v16  ;;  %v1382_v60 = vadd.f32 %v1610_v4, %v1555_v14 }
 0x180   : > { %v1373_v18 = vpop.f32.mrf.mxu0 }
 0x181   : > { %1424 = vst [vmem:[%s1960_s30 + $0x38] sm:$0xff] %v1382_v60  ;;  %v1374_v6 = vadd.f32 %v1555_v14, %v1373_v18 }
 0x183   : > { %1422 = vst [vmem:[%s1960_s30 + $0x28] sm:$0xff] %v1374_v6 }
 0x18c   : > { %v1617_v52 = vpop.f32.mrf.mxu1 }
 0x18d   : > { %v1411_v2 = vadd.f32 %v1617_v52, %v1555_v14 }
 0x18e   : > { %v1402_v19 = vpop.f32.mrf.mxu1 }
 0x18f   : > { %1431 = vst [vmem:[%s1960_s30 + $0x70] sm:$0xff] %v1411_v2  ;;  %v1403_v22 = vadd.f32 %v1555_v14, %v1402_v19 }
 0x190   : > { %v1618_v23 = vpop.f32.mrf.mxu1 }
 0x191   : > { %1429 = vst [vmem:[%s1960_s30 + $0x60] sm:$0xff] %v1403_v22  ;;  %v1414_v57 = vadd.f32 %v1618_v23, %v1555_v14 }
 0x192   : > { %v1405_v17 = vpop.f32.mrf.mxu1 }
 0x193   : > { %1432 = vst [vmem:[%s1960_s30 + $0x78] sm:$0xff] %v1414_v57  ;;  %v1406_v11 = vadd.f32 %v1555_v14, %v1405_v17 }
 0x195   : > { %1430 = vst [vmem:[%s1960_s30 + $0x68] sm:$0xff] %v1406_v11 }
 0x196   : > { %1730 = shalt.err (!%p1727_p5)
}
 0x197   : > { %s1731_s12 = scalar_lea.hbm %s2595_s21, 2048  ;;  %s1735_s26 = scalar_lea.hbm %s2659_s5, 8192 }
 0x198   : > { %p1732_p6 = scmp.ne.s32.totalorder %s2595_s21, %s1731_s12  ;;  %p1736_p10 = scmp.lt.s32.totalorder %s2595_s21, %s2659_s5 }
 0x199   : > { %p1737_p11 = scmp.lt.s32.totalorder %s1735_s26, %s1731_s12 }
 0x19a   : > { %p1733_p7 = pnand %p1732_p6, %p1897_p3 }
 0x19b   : > { %p1738_p12 = por %p1737_p11, %p1736_p10 }
 0x19c   : > { %p1734_p9 = pneg %p1733_p7 }
 0x19e   : > { %p1739_p13 = pnand %p1738_p12, %p1734_p9 }
 0x1a0   : > { %1742 = shalt.err (!%p1739_p13)
}
 0x1a1   : > { %s1814_s10 = smov 128   ;;  %s1815_s13 = smov 8  }
 0x1a2   : > { %1635 = dma.vmem_to_hbm [thread:$0]  (%p1897_p3), %s2597_s8, 2048, %s2595_s21, %s2603_s22, %s1814_s10, %s1814_s10, %s1815_s13  }
 0x1a3 PF: > { %p1641_p0 = scmp.ge.s32.totalorder %s1811_s25, 2  ;;  %s1464_s14 = sand.u32 1, %s1783_s18  }
 0x1a4   : > { %s1465_s15 = scalar_lea.sflag [#allocation5], %s1464_s14 }
 0x1a5   : > { %p1638_p1 = pnand %p1641_p0, %p1906_p8 }
 0x1a7   : > { %p1639_p2 = pneg %p1638_p1 }
 0x1a9   : > { %1778 = dma.done.wait (%p1639_p2), %s1465_s15, 2048  }
 0x1aa   : > { %1780 = vsyncadd (%p1639_p2), %s1465_s15, 4294965248  ;;  %s18_s25 = sadd.s32 1, %s1811_s25   ;;  %s2662_s18 = smov %s1787_s19 }
 0x1ab   : > { %p15_p4 = scmp.ge.s32.totalorder %s18_s25, 6   ;;  %s2663_s19 = smov %s1791_s20 }
 0x1ac   : > { %s2664_s20 = smov %s1915_s11  ;;  %s2665_s21 = smov %s1803_s23 }
 0x1ad   : > { %s2666_s22 = smov %s1807_s24  ;;  %s2667_s23 = smov %s2670_s28 }
 0x1ae   : > { %s2668_s24 = smov %s2674_s29  ;;  %17 = sbr.rel (!%p15_p4) target bundleno = 5 (0x5), region = 120 }
 0x1b3   :  { %1470 = vsyncpa [#allocation5], 1 }
 0x1b4   :  { %1472 = vsyncpa [#allocation5 + $0x1], 1 }
 0x1b5   :  { %1473 = vsyncmov [#allocation3] }
 0x1b8   :  { %s1474_s6 = vpop.sfrf %1473 }
 0x1b9   :  { %p1570_p3 = scmp.ne.s32.totalorder %s1474_s6, 0 }
 0x1bb   :  { %1478 = shalt.err (%p1570_p3)  }

</bundles_post_ra>
